<compile_context>
chip_gen: v7x
topology: tpu7x:2x2x1
jax: 0.10.0
libtpu: 0.0.40
codegen_flags: <defaults>
</compile_context>

<pallas_src>
import functools

import jax
import jax.numpy as jnp
from jax.experimental import pallas as pl
from jax.experimental.pallas import tpu as pltpu


_LANE = 128       # TPU lane width (last-dim alignment)
_SUBLANE = 32     # row-tile alignment (covers f32/bf16/int8 sublane packing)
_MIB = 1024 * 1024


def _round_up(x, m):
    return ((x + m - 1) // m) * m


def _vmem_capacity_bytes():
    try:
        cap = int(pltpu.get_tpu_info().vmem_capacity_bytes)
        if cap > 0:
            return cap
    except Exception:
        pass
    return 64 * _MIB  # conservative fallback (v7x per-TensorCore size)


_VMEM_CAP = _vmem_capacity_bytes()
# Planning budget for tiles/weights (leaves headroom for Mosaic internal
# scratch, semaphores and intermediates the estimate below misses).
#   v7x:  64 MiB -> ~44.8 MiB,   v5e/v6e: 128 MiB -> ~89.6 MiB
_VMEM_BUDGET = max(int(_VMEM_CAP * 0.70), 16 * _MIB)
# Scoped-VMEM limit handed to the compiler (above planning budget, below
# physical): v7x -> 56 MiB, v5e/v6e -> 120 MiB.
_VMEM_LIMIT = max(_VMEM_CAP - 8 * _MIB, int(_VMEM_CAP * 0.875))

_HAS_BUFFERED = hasattr(pl, "Buffered")


# ----------------------------------------------------------------------------
# Kernels
# ----------------------------------------------------------------------------
def _mlp_kernel_fused(x_ref, w1_ref, b1_ref, w2_ref, b2_ref, o_ref, *,
                      compute_dtype):
    """Hidden dim fully resident: fc1 -> bias/ReLU -> fc2, no accumulator."""
    x = x_ref[...]
    w1 = w1_ref[...]
    if compute_dtype is not None:
        x = x.astype(compute_dtype)
        w1 = w1.astype(compute_dtype)
    h = jnp.dot(x, w1, preferred_element_type=jnp.float32)
    # bias + ReLU on the f32 result (f32 VPU path -- safe on v5e).
    h = jnp.maximum(h + b1_ref[...].astype(jnp.float32), 0.0)

    w2 = w2_ref[...]
    if compute_dtype is not None:
        w2 = w2.astype(compute_dtype)
    y = jnp.dot(h.astype(w2.dtype), w2, preferred_element_type=jnp.float32)
    o_ref[...] = (y + b2_ref[...].astype(jnp.float32)).astype(o_ref.dtype)


def _mlp_kernel_tiled(x_ref, w1_ref, b1_ref, w2_ref, b2_ref, o_ref, acc_ref, *,
                      compute_dtype):
    """Hidden dim tiled (grid axis 1, 'arbitrary'), f32 accumulator scratch."""
    kh = pl.program_id(1)

    @pl.when(kh == 0)
    def _():
        acc_ref[...] = jnp.zeros_like(acc_ref)

    x = x_ref[...]
    w1 = w1_ref[...]
    if compute_dtype is not None:
        x = x.astype(compute_dtype)
        w1 = w1.astype(compute_dtype)
    h = jnp.dot(x, w1, preferred_element_type=jnp.float32)
    h = jnp.maximum(h + b1_ref[...].astype(jnp.float32), 0.0)

    w2 = w2_ref[...]
    if compute_dtype is not None:
        w2 = w2.astype(compute_dtype)
    acc_ref[...] += jnp.dot(h.astype(w2.dtype), w2,
                            preferred_element_type=jnp.float32)

    @pl.when(kh == pl.num_programs(1) - 1)
    def _():
        o_ref[...] = (acc_ref[...] + b2_ref[...].astype(jnp.float32)
                      ).astype(o_ref.dtype)


# ----------------------------------------------------------------------------
# Wrapper
# ----------------------------------------------------------------------------
@functools.partial(
    jax.jit,
    static_argnames=("tm", "hidden_tile", "compute_dtype", "single_buffer"))
def _mlp_forward_impl(x, w1, b1, w2, b2, *, tm, hidden_tile, compute_dtype,
                      single_buffer):
    in_ch, hidden = w1.shape
    out_ch = w2.shape[1]

    lead_shape = x.shape[:-1]
    xf = x.reshape(-1, in_ch)
    m = xf.shape[0]

    x_bytes = jnp.dtype(x.dtype).itemsize
    w_bytes = jnp.dtype(w1.dtype).itemsize
    o_bytes = x_bytes

    # ---- lane-dense output width (exact: padded W2 cols / b2 entries are 0).
    out_pad = _round_up(out_ch, _LANE)
    h_full = _round_up(hidden, _LANE)

    use_once = bool(single_buffer and _HAS_BUFFERED)
    w_buf = 1 if use_once else 2
    weight_budget = _VMEM_BUDGET // 2

    # ---- hidden tiling: keep weights resident whenever they fit the budget.
    if hidden_tile is not None:
        th = _round_up(min(int(hidden_tile), h_full), _LANE)
    else:
        resident_bytes = w_buf * ((in_ch + out_pad + 1) * h_full
                                  + out_pad) * w_bytes
        if resident_bytes <= weight_budget:
            th = h_full
        else:
            denom = 2 * (in_ch + out_pad + 1) * w_bytes   # double-buffered slices
            th = max(_LANE, (weight_budget // denom) // _LANE * _LANE)
            th = min(th, h_full)
    n_kh = -(-hidden // th)
    h_pad = n_kh * th

    # Zero-pad hidden / out dims (exact: relu(0+0)=0; zero W2 rows/cols add 0).
    if h_pad != hidden:
        w1 = jnp.pad(w1, ((0, 0), (0, h_pad - hidden)))
        b1 = jnp.pad(b1, ((0, 0), (0, h_pad - hidden)))
        w2 = jnp.pad(w2, ((0, h_pad - hidden), (0, 0)))
    if out_pad != out_ch:
        w2 = jnp.pad(w2, ((0, 0), (0, out_pad - out_ch)))
        b2 = jnp.pad(b2, ((0, 0), (0, out_pad - out_ch)))

    # ---- row tiling: sized from the remaining VMEM budget, no host-side pad
    # of the activations (Pallas handles the ragged last row block).
    if n_kh == 1:
        w_foot = w_buf * ((in_ch + 1) * th + th * out_pad + out_pad) * w_bytes
        acc_bytes = 0
    else:
        w_foot = (2 * ((in_ch + 1) * th + th * out_pad)
                  + w_buf * out_pad) * w_bytes
        acc_bytes = out_pad * 4
    row_budget = max(_VMEM_BUDGET - w_foot, 4 * _MIB)
    per_row = (2 * in_ch * x_bytes          # x block, double buffered
               + 2 * out_pad * o_bytes      # out block, double buffered
               + acc_bytes                  # f32 accumulator scratch
               + 6 * th)                    # rough headroom for the h tile
    tm_cap = max((row_budget // per_row) // _SUBLANE * _SUBLANE, _SUBLANE)
    tm_eff = min(_round_up(tm, _SUBLANE), _round_up(m, _SUBLANE), tm_cap)
    # v7x megacore: keep >= 2 "parallel" row steps when there is enough work.
    if m >= 2 * _SUBLANE and -(-m // tm_eff) < 2:
        tm_eff = max(_SUBLANE, _round_up(-(-m // 2), _SUBLANE))
    n_rows = -(-m // tm_eff)

    once = dict(pipeline_mode=pl.Buffered(1)) if use_once else {}

    if n_kh == 1:
        kernel = functools.partial(_mlp_kernel_fused,
                                   compute_dtype=compute_dtype)
        grid_spec = pltpu.PrefetchScalarGridSpec(
            num_scalar_prefetch=0,
            grid=(n_rows,),
            in_specs=[
                pl.BlockSpec((tm_eff, in_ch), lambda i: (i, 0)),        # x rows
                pl.BlockSpec((in_ch, th), lambda i: (0, 0), **once),    # W1
                pl.BlockSpec((1, th), lambda i: (0, 0), **once),        # b1
                pl.BlockSpec((th, out_pad), lambda i: (0, 0), **once),  # W2
                pl.BlockSpec((1, out_pad), lambda i: (0, 0), **once),   # b2
            ],
            out_specs=pl.BlockSpec((tm_eff, out_pad), lambda i: (i, 0)),
            scratch_shapes=[],
        )
        dim_sem = ("parallel",)
    else:
        kernel = functools.partial(_mlp_kernel_tiled,
                                   compute_dtype=compute_dtype)
        grid_spec = pltpu.PrefetchScalarGridSpec(
            num_scalar_prefetch=0,
            grid=(n_rows, n_kh),
            in_specs=[
                pl.BlockSpec((tm_eff, in_ch), lambda i, k: (i, 0)),     # x rows
                pl.BlockSpec((in_ch, th), lambda i, k: (0, k)),         # W1 cols
                pl.BlockSpec((1, th), lambda i, k: (0, k)),             # b1 slice
                pl.BlockSpec((th, out_pad), lambda i, k: (k, 0)),       # W2 rows
                pl.BlockSpec((1, out_pad), lambda i, k: (0, 0), **once),# b2
            ],
            out_specs=pl.BlockSpec((tm_eff, out_pad), lambda i, k: (i, 0)),
            scratch_shapes=[pltpu.VMEM((tm_eff, out_pad), jnp.float32)],
        )
        dim_sem = ("parallel", "arbitrary")

    out = pl.pallas_call(
        kernel,
        out_shape=jax.ShapeDtypeStruct((m, out_pad), x.dtype),
        grid_spec=grid_spec,
        compiler_params=pltpu.CompilerParams(
            dimension_semantics=dim_sem,
            vmem_limit_bytes=_VMEM_LIMIT,
        ),
    )(xf, w1, b1, w2, b2)

    if out_pad != out_ch:
        out = out[:, :out_ch]
    return out.reshape(*lead_shape, out_ch)


# One-time fallback in case this jax/Mosaic build rejects single-buffered
# (pipeline_mode=pl.Buffered(1)) BlockSpecs.
_SINGLE_BUFFER_STATE = {"ok": _HAS_BUFFERED}


def mlp_forward(x, w1, b1, w2, b2, *, tm=512, hidden_tile=None,
                compute_dtype=None):
    """x: (..., in_channels) -> (..., out_channels).

    w1: (in, hidden), b1: (1, hidden), w2: (hidden, out), b2: (1, out).
    `compute_dtype=jnp.bfloat16` opts f32 inputs into the bf16 MXU path
    (accumulation stays f32).  `hidden_tile` forces a hidden tile width
    (testing / very large layers).
    """
    kwargs = dict(tm=tm, hidden_tile=hidden_tile, compute_dtype=compute_dtype)
    if _SINGLE_BUFFER_STATE["ok"]:
        try:
            return _mlp_forward_impl(x, w1, b1, w2, b2,
                                     single_buffer=True, **kwargs)
        except Exception:
            _SINGLE_BUFFER_STATE["ok"] = False
    return _mlp_forward_impl(x, w1, b1, w2, b2, single_buffer=False, **kwargs)


# ----------------------------------------------------------------------------
# Params / reference
# ----------------------------------------------------------------------------
def init_mlp_params(key, in_channels, hidden_channels, out_channels,
                    dtype=jnp.float32):
    """nn.Linear-style U(-1/sqrt(fan_in), 1/sqrt(fan_in)) init.

    Weights are stored already transposed to (in, out) layout for the kernel.
    """
    k1, k2, k3, k4 = jax.random.split(key, 4)
    lim1 = 1.0 / (in_channels ** 0.5)
    lim2 = 1.0 / (hidden_channels ** 0.5)
    w1 = jax.random.uniform(k1, (in_channels, hidden_channels),
                            minval=-lim1, maxval=lim1, dtype=dtype)
    b1 = jax.random.uniform(k2, (1, hidden_channels),
                            minval=-lim1, maxval=lim1, dtype=dtype)
    w2 = jax.random.uniform(k3, (hidden_channels, out_channels),
                            minval=-lim2, maxval=lim2, dtype=dtype)
    b2 = jax.random.uniform(k4, (1, out_channels),
                            minval=-lim2, maxval=lim2, dtype=dtype)
    return w1, b1, w2, b2


def mlp_reference(x, w1, b1, w2, b2):
    h = jnp.maximum(jnp.dot(x, w1, precision="highest") + b1[0], 0.0)
    return jnp.dot(h, w2, precision="highest") + b2[0]


if __name__ == "__main__":
    key = jax.random.PRNGKey(0)
    kx, kx2, kp = jax.random.split(key, 3)

    in_channels, hidden_channels, out_channels = 64, 256, 32
    # MLP acts on the last dim; leading dims flatten to 512 rows -> 2 row
    # tiles (both v7x TensorCores get work via the "parallel" row axis).
    x = jax.random.normal(kx, (4, 128, in_channels), dtype=jnp.float32)
    w1, b1, w2, b2 = init_mlp_params(kp, in_channels, hidden_channels,
                                     out_channels)
    y_ref = mlp_reference(x, w1, b1, w2, b2)

    # 1) f32, resident-weights fast path (no accumulator scratch).
    y = mlp_forward(x, w1, b1, w2, b2)
    jax.block_until_ready(y)
    assert y.shape == (4, 128, out_channels)
    assert jnp.allclose(y, y_ref, atol=1e-2, rtol=1e-2)

    # 2) Ragged row count (111 rows): cdiv grid + masked last row block.
    x2 = jax.random.normal(kx2, (3, 37, in_channels), dtype=jnp.float32)
    y2 = mlp_forward(x2, w1, b1, w2, b2)
    jax.block_until_ready(y2)
    assert jnp.allclose(y2, mlp_reference(x2, w1, b1, w2, b2),
                        atol=1e-2, rtol=1e-2)

    # 3) Forced hidden tiling: exercises the accumulator (tiled) kernel path.
    y3 = mlp_forward(x, w1, b1, w2, b2, hidden_tile=128)
    jax.block_until_ready(y3)
    assert jnp.allclose(y3, y_ref, atol=1e-2, rtol=1e-2)

    # 4) bf16 activations + weights (f32 accumulation inside the kernel).
    xb = x.astype(jnp.bfloat16)
    wb = [p.astype(jnp.bfloat16) for p in (w1, b1, w2, b2)]
    yb = mlp_forward(xb, *wb)
    jax.block_until_ready(yb)
    assert jnp.allclose(yb.astype(jnp.float32), y_ref, atol=5e-2, rtol=5e-2)

    # 5) Opt-in bf16 MXU compute path for f32 inputs (v6e/v7x throughput).
    y5 = mlp_forward(x, w1, b1, w2, b2, compute_dtype=jnp.bfloat16)
    jax.block_until_ready(y5)
    assert jnp.allclose(y5, y_ref, atol=5e-2, rtol=5e-2)

    print("KERNEL_OK")
</pallas_src>

<mosaic_0001>
module attributes {stable_mosaic.version = 11 : i64} {
  func.func @_mlp_kernel_fused(%arg0: i32, %arg1: memref<256x64xf32, #tpu.memory_space<vmem>>, %arg2: memref<64x256xf32, #tpu.memory_space<vmem>>, %arg3: memref<1x256xf32, #tpu.memory_space<vmem>>, %arg4: memref<256x128xf32, #tpu.memory_space<vmem>>, %arg5: memref<1x128xf32, #tpu.memory_space<vmem>>, %arg6: memref<256x128xf32, #tpu.memory_space<vmem>>) attributes {dimension_semantics = [#tpu.dimension_semantics<parallel>], iteration_bounds = array<i64: 2>, scalar_prefetch = 0 : i64, scratch_operands = 0 : i64, tpu.core_type = #tpu.core_type<tc>, window_params = [{transform_indices = @transform_0, window_bounds = array<i64: 256, 64>}, {pipeline_mode = #tpu.pipeline_mode<synchronous>, transform_indices = @transform_1, window_bounds = array<i64: 64, 256>}, {pipeline_mode = #tpu.pipeline_mode<synchronous>, transform_indices = @transform_2, window_bounds = array<i64: 1, 256>}, {pipeline_mode = #tpu.pipeline_mode<synchronous>, transform_indices = @transform_3, window_bounds = array<i64: 256, 128>}, {pipeline_mode = #tpu.pipeline_mode<synchronous>, transform_indices = @transform_4, window_bounds = array<i64: 1, 128>}, {transform_indices = @transform_5, window_bounds = array<i64: 256, 128>}]} {
    %c0 = arith.constant 0 : index
    %c0_0 = arith.constant 0 : index
    %0 = vector.load %arg1[%c0, %c0_0] : memref<256x64xf32, #tpu.memory_space<vmem>>, vector<256x64xf32>
    %c0_1 = arith.constant 0 : index
    %c0_2 = arith.constant 0 : index
    %1 = vector.load %arg2[%c0_1, %c0_2] : memref<64x256xf32, #tpu.memory_space<vmem>>, vector<64x256xf32>
    %cst = arith.constant dense<0.000000e+00> : vector<256x256xf32>
    %2 = tpu.matmul %0, %1, %cst {dimension_numbers = #tpu.dot_dimension_numbers<[1], [0], [0], [1], [0, 0, 1, 1], [], []>} : vector<256x64xf32>, vector<64x256xf32>, vector<256x256xf32> -> vector<256x256xf32>
    %c0_3 = arith.constant 0 : index
    %c0_4 = arith.constant 0 : index
    %3 = vector.load %arg3[%c0_3, %c0_4] : memref<1x256xf32, #tpu.memory_space<vmem>>, vector<1x256xf32>
    %4 = vector.broadcast %3 : vector<1x256xf32> to vector<256x256xf32>
    %5 = arith.addf %2, %4 : vector<256x256xf32>
    %cst_5 = arith.constant 0.000000e+00 : f32
    %6 = vector.broadcast %cst_5 : f32 to vector<256x256xf32>
    %7 = arith.maximumf %5, %6 : vector<256x256xf32>
    %c0_6 = arith.constant 0 : index
    %c0_7 = arith.constant 0 : index
    %8 = vector.load %arg4[%c0_6, %c0_7] : memref<256x128xf32, #tpu.memory_space<vmem>>, vector<256x128xf32>
    %cst_8 = arith.constant dense<0.000000e+00> : vector<256x128xf32>
    %9 = tpu.matmul %7, %8, %cst_8 {dimension_numbers = #tpu.dot_dimension_numbers<[1], [0], [0], [1], [0, 0, 1, 1], [], []>} : vector<256x256xf32>, vector<256x128xf32>, vector<256x128xf32> -> vector<256x128xf32>
    %c0_9 = arith.constant 0 : index
    %c0_10 = arith.constant 0 : index
    %10 = vector.load %arg5[%c0_9, %c0_10] : memref<1x128xf32, #tpu.memory_space<vmem>>, vector<1x128xf32>
    %11 = vector.broadcast %10 : vector<1x128xf32> to vector<256x128xf32>
    %12 = arith.addf %9, %11 : vector<256x128xf32>
    %c0_11 = arith.constant 0 : index
    %c0_12 = arith.constant 0 : index
    %13 = vector.load %arg6[%c0_11, %c0_12] : memref<256x128xf32, #tpu.memory_space<vmem>>, vector<256x128xf32>
    tpu.vector_store %arg6[%c0_11, %c0_12], %12 {strides = array<i32>} : memref<256x128xf32, #tpu.memory_space<vmem>>, vector<256x128xf32>,
    return
  }
  func.func @transform_0(%arg0: i32) -> (i32, i32) {
    %c0_i32 = arith.constant 0 : i32
    %c0_i32_0 = arith.constant 0 : i32
    return %arg0, %c0_i32 : i32, i32
  }
  func.func @transform_1(%arg0: i32) -> (i32, i32) {
    %c0_i32 = arith.constant 0 : i32
    %c0_i32_0 = arith.constant 0 : i32
    %c0_i32_1 = arith.constant 0 : i32
    return %c0_i32, %c0_i32_0 : i32, i32
  }
  func.func @transform_2(%arg0: i32) -> (i32, i32) {
    %c0_i32 = arith.constant 0 : i32
    %c0_i32_0 = arith.constant 0 : i32
    %c0_i32_1 = arith.constant 0 : i32
    return %c0_i32, %c0_i32_0 : i32, i32
  }
  func.func @transform_3(%arg0: i32) -> (i32, i32) {
    %c0_i32 = arith.constant 0 : i32
    %c0_i32_0 = arith.constant 0 : i32
    %c0_i32_1 = arith.constant 0 : i32
    return %c0_i32, %c0_i32_0 : i32, i32
  }
  func.func @transform_4(%arg0: i32) -> (i32, i32) {
    %c0_i32 = arith.constant 0 : i32
    %c0_i32_0 = arith.constant 0 : i32
    %c0_i32_1 = arith.constant 0 : i32
    return %c0_i32, %c0_i32_0 : i32, i32
  }
  func.func @transform_5(%arg0: i32) -> (i32, i32) {
    %c0_i32 = arith.constant 0 : i32
    %c0_i32_0 = arith.constant 0 : i32
    return %arg0, %c0_i32 : i32, i32
  }
}

module attributes {stable_mosaic.version = 11 : i64} {
  func.func @_mlp_kernel_fused(%arg0: i32, %arg1: memref<256x64xf32, #tpu.memory_space<vmem>>, %arg2: memref<64x256xf32, #tpu.memory_space<vmem>>, %arg3: memref<1x256xf32, #tpu.memory_space<vmem>>, %arg4: memref<256x128xf32, #tpu.memory_space<vmem>>, %arg5: memref<1x128xf32, #tpu.memory_space<vmem>>, %arg6: memref<256x128xf32, #tpu.memory_space<vmem>>) attributes {dimension_semantics = [#tpu.dimension_semantics<parallel>], iteration_bounds = array<i64: 2>, scalar_prefetch = 0 : i64, scratch_operands = 0 : i64, tpu.core_type = #tpu.core_type<tc>, window_params = [{transform_indices = @transform_0, window_bounds = array<i64: 256, 64>}, {pipeline_mode = #tpu.pipeline_mode<synchronous>, transform_indices = @transform_1, window_bounds = array<i64: 64, 256>}, {pipeline_mode = #tpu.pipeline_mode<synchronous>, transform_indices = @transform_2, window_bounds = array<i64: 1, 256>}, {pipeline_mode = #tpu.pipeline_mode<synchronous>, transform_indices = @transform_3, window_bounds = array<i64: 256, 128>}, {pipeline_mode = #tpu.pipeline_mode<synchronous>, transform_indices = @transform_4, window_bounds = array<i64: 1, 128>}, {transform_indices = @transform_5, window_bounds = array<i64: 256, 128>}]} {
    %c0 = arith.constant 0 : index
    %c0_0 = arith.constant 0 : index
    %0 = vector.load %arg1[%c0, %c0_0] : memref<256x64xf32, #tpu.memory_space<vmem>>, vector<256x64xf32>
    %c0_1 = arith.constant 0 : index
    %c0_2 = arith.constant 0 : index
    %1 = vector.load %arg2[%c0_1, %c0_2] : memref<64x256xf32, #tpu.memory_space<vmem>>, vector<64x256xf32>
    %cst = arith.constant dense<0.000000e+00> : vector<256x256xf32>
    %2 = tpu.matmul %0, %1, %cst {dimension_numbers = #tpu.dot_dimension_numbers<[1], [0], [0], [1], [0, 0, 1, 1], [], []>} : vector<256x64xf32>, vector<64x256xf32>, vector<256x256xf32> -> vector<256x256xf32>
    %c0_3 = arith.constant 0 : index
    %c0_4 = arith.constant 0 : index
    %3 = vector.load %arg3[%c0_3, %c0_4] : memref<1x256xf32, #tpu.memory_space<vmem>>, vector<1x256xf32>
    %4 = vector.broadcast %3 : vector<1x256xf32> to vector<256x256xf32>
    %5 = arith.addf %2, %4 : vector<256x256xf32>
    %cst_5 = arith.constant 0.000000e+00 : f32
    %6 = vector.broadcast %cst_5 : f32 to vector<256x256xf32>
    %7 = arith.maximumf %5, %6 : vector<256x256xf32>
    %c0_6 = arith.constant 0 : index
    %c0_7 = arith.constant 0 : index
    %8 = vector.load %arg4[%c0_6, %c0_7] : memref<256x128xf32, #tpu.memory_space<vmem>>, vector<256x128xf32>
    %cst_8 = arith.constant dense<0.000000e+00> : vector<256x128xf32>
    %9 = tpu.matmul %7, %8, %cst_8 {dimension_numbers = #tpu.dot_dimension_numbers<[1], [0], [0], [1], [0, 0, 1, 1], [], []>} : vector<256x256xf32>, vector<256x128xf32>, vector<256x128xf32> -> vector<256x128xf32>
    %c0_9 = arith.constant 0 : index
    %c0_10 = arith.constant 0 : index
    %10 = vector.load %arg5[%c0_9, %c0_10] : memref<1x128xf32, #tpu.memory_space<vmem>>, vector<1x128xf32>
    %11 = vector.broadcast %10 : vector<1x128xf32> to vector<256x128xf32>
    %12 = arith.addf %9, %11 : vector<256x128xf32>
    %c0_11 = arith.constant 0 : index
    %c0_12 = arith.constant 0 : index
    %13 = vector.load %arg6[%c0_11, %c0_12] : memref<256x128xf32, #tpu.memory_space<vmem>>, vector<256x128xf32>
    tpu.vector_store %arg6[%c0_11, %c0_12], %12 {strides = array<i32>} : memref<256x128xf32, #tpu.memory_space<vmem>>, vector<256x128xf32>,
    return
  }
  func.func @transform_0(%arg0: i32) -> (i32, i32) {
    %c0_i32 = arith.constant 0 : i32
    %c0_i32_0 = arith.constant 0 : i32
    return %arg0, %c0_i32 : i32, i32
  }
  func.func @transform_1(%arg0: i32) -> (i32, i32) {
    %c0_i32 = arith.constant 0 : i32
    %c0_i32_0 = arith.constant 0 : i32
    %c0_i32_1 = arith.constant 0 : i32
    return %c0_i32, %c0_i32_0 : i32, i32
  }
  func.func @transform_2(%arg0: i32) -> (i32, i32) {
    %c0_i32 = arith.constant 0 : i32
    %c0_i32_0 = arith.constant 0 : i32
    %c0_i32_1 = arith.constant 0 : i32
    return %c0_i32, %c0_i32_0 : i32, i32
  }
  func.func @transform_3(%arg0: i32) -> (i32, i32) {
    %c0_i32 = arith.constant 0 : i32
    %c0_i32_0 = arith.constant 0 : i32
    %c0_i32_1 = arith.constant 0 : i32
    return %c0_i32, %c0_i32_0 : i32, i32
  }
  func.func @transform_4(%arg0: i32) -> (i32, i32) {
    %c0_i32 = arith.constant 0 : i32
    %c0_i32_0 = arith.constant 0 : i32
    %c0_i32_1 = arith.constant 0 : i32
    return %c0_i32, %c0_i32_0 : i32, i32
  }
  func.func @transform_5(%arg0: i32) -> (i32, i32) {
    %c0_i32 = arith.constant 0 : i32
    %c0_i32_0 = arith.constant 0 : i32
    return %arg0, %c0_i32 : i32, i32
  }
}

</mosaic_0001>

<bundles_post_ra>
// kernel: _mlp_forward_impl.1
= control target key start
LH: loop header
LB: loop body
LE: loop exit
PB: predicated region body
PF: predicated region fallthrough
CT: control target
= control target key end

     0   :  { %s1248_s18 = smov 0   ;;  %s1688_s0 = inlined_call_operand.vmem [shape: f32[512,64], index: 0, kind: input, shape index: {}]   ;;  %s1689_s1 = inlined_call_operand.vmem [shape: f32[64,256], index: 1, kind: input, shape index: {}]   ;;  %s1690_s2 = inlined_call_operand.vmem [shape: f32[1,256], index: 2, kind: input, shape index: {}]   ;;  %s1691_s3 = inlined_call_operand.vmem [shape: f32[256,128], index: 3, kind: input, shape index: {}]   ;;  %s1692_s4 = inlined_call_operand.vmem [shape: f32[1,128], index: 4, kind: input, shape index: {}]   ;;  %s1693_s5 = inlined_call_operand.vmem [shape: f32[512,128], index: 5, kind: output, shape index: {}]  }
   0x1 LB: > { %s1058_s19 = sadd.s32 4294967295, %s1214_s18   ;;  %p1062_p0 = scmp.ge.s32.totalorder %s1214_s18, 1  ;;  %s1214_s18 = sphi %s1248_s18, %s15_s18  }
   0x2   : > { %p188_p1 = scmp.lt.s32.totalorder %s1214_s18, 3 }
   0x4   : > { %p189_p2 = pnand %p1062_p0, %p188_p1 }
   0x5   : > { %v261_v0 = vld [vmem:[%s1689_s1 + $0x8] sm:$0xff] (!%p189_p2)  ;;  %v263_v1 = vld [vmem:[%s1689_s1 + $0x18] sm:$0xff] (!%p189_p2)  ;;  %v260_v2 = vld [vmem:[%s1689_s1] sm:$0xff] (!%p189_p2)  ;;  %s1063_s26 = sshll.u32 (!%p189_p2), %s1058_s19, 5  ;;  %v1216_v7 = vmov (!%p189_p2), 0.0   ;;  %vm288_vm0 = vcmask (!%p189_p2), 523264  }
   0x6   : > { %192 = sbr.rel (%p189_p2) target bundleno = 581 (0x245), region = 40  ;;  %v1102_v3 = vpack.c.bf16 (!%p189_p2), %v263_v1, %v261_v0  ;;  %v262_v4 = vld [vmem:[%s1689_s1 + $0x10] sm:$0xff] (!%p189_p2)  ;;  %v265_v5 = vld [vmem:[%s1689_s1 + $0x28] sm:$0xff] (!%p189_p2)  ;;  %v267_v6 = vld [vmem:[%s1689_s1 + $0x38] sm:$0xff] (!%p189_p2)  ;;  %449 = vmatprep.mubr.f32.mxu0 (!%p189_p2), %v1216_v7  ;;  %p217_p3 = scmp.lt.s32.totalorder (!%p189_p2), %s1063_s26, 63  ;;  %v1217_v26 = vmov (!%p189_p2), 0.0|0.0  }
   0x7   : > { %v1104_v8 = vpack.c.bf16 (!%p189_p2), %v262_v4, %v260_v2  ;;  %v1106_v9 = vpack.c.bf16 (!%p189_p2), %v267_v6, %v265_v5  ;;  %v264_v10 = vld [vmem:[%s1689_s1 + $0x20] sm:$0xff] (!%p189_p2)  ;;  %v266_v11 = vld [vmem:[%s1689_s1 + $0x30] sm:$0xff] (!%p189_p2)  ;;  %v269_v12 = vld [vmem:[%s1689_s1 + $0x48] sm:$0xff] (!%p189_p2)  ;;  %1166 = vmatprep.subr.bf16.mxu1 (!%p189_p2), %v1217_v26 }
   0x8   : > { %1103 = vmatprep.subr.bf16.mxu0 (!%p189_p2), %v1102_v3  ;;  %v271_v13 = vld [vmem:[%s1689_s1 + $0x58] sm:$0xff] (!%p189_p2)  ;;  %v1108_v14 = vpack.c.bf16 (!%p189_p2), %v266_v11, %v264_v10  ;;  %v268_v16 = vld [vmem:[%s1689_s1 + $0x40] sm:$0xff] (!%p189_p2)  ;;  %v270_v17 = vld [vmem:[%s1689_s1 + $0x50] sm:$0xff] (!%p189_p2) }
   0x9   : > { %1105 = vmatpush1.bf16.msra.mxu0 (!%p189_p2), %v1104_v8  ;;  %v1110_v15 = vpack.c.bf16 (!%p189_p2), %v271_v13, %v269_v12  ;;  %v273_v18 = vld [vmem:[%s1689_s1 + $0x68] sm:$0xff] (!%p189_p2)  ;;  %v275_v19 = vld [vmem:[%s1689_s1 + $0x78] sm:$0xff] (!%p189_p2)  ;;  %v1112_v20 = vpack.c.bf16 (!%p189_p2), %v270_v17, %v268_v16  ;;  %v272_v22 = vld [vmem:[%s1689_s1 + $0x60] sm:$0xff] (!%p189_p2) }
   0xa   : > { %1107 = vmatprep.subr.bf16.mxu0 (!%p189_p2), %v1106_v9  ;;  %v1114_v21 = vpack.c.bf16 (!%p189_p2), %v275_v19, %v273_v18  ;;  %v274_v23 = vld [vmem:[%s1689_s1 + $0x70] sm:$0xff] (!%p189_p2)  ;;  %v706_v27 = vld [vmem:[%s1691_s3] sm:$0xff] (!%p189_p2)  ;;  %v707_v28 = vld [vmem:[%s1691_s3 + $0x8] sm:$0xff] (!%p189_p2) }
   0xb   : > { %v1116_v24 = vpack.c.bf16 (!%p189_p2), %v274_v23, %v272_v22  ;;  %v708_v29 = vld [vmem:[%s1691_s3 + $0x10] sm:$0xff] (!%p189_p2)  ;;  %v709_v30 = vld [vmem:[%s1691_s3 + $0x18] sm:$0xff] (!%p189_p2)  ;;  %v1119_v31 = vpack.c.bf16 (!%p189_p2), %v707_v28, %v706_v27  ;;  %v710_v34 = vld [vmem:[%s1691_s3 + $0x20] sm:$0xff] (!%p189_p2) }
   0xc   : > { %v1122_v33 = vpack.c.bf16 (!%p189_p2), %v709_v30, %v708_v29  ;;  %v711_v35 = vld [vmem:[%s1691_s3 + $0x28] sm:$0xff] (!%p189_p2)  ;;  %v712_v38 = vld [vmem:[%s1691_s3 + $0x30] sm:$0xff] (!%p189_p2)  ;;  %v713_v39 = vld [vmem:[%s1691_s3 + $0x38] sm:$0xff] (!%p189_p2) }
   0xd   : > { %s1695_s26 = smov (!%p217_p3, %s1063_s26), 63  ;;  %1109 = vmatpush1.bf16.msra.mxu0 %v1108_v14  ;;  %1182 = vmatpush1.bf16.msra.mxu1 %v1119_v31  ;;  %v1125_v37 = vpack.c.bf16 %v711_v35, %v710_v34  ;;  %v1128_v41 = vpack.c.bf16 %v713_v39, %v712_v38  ;;  %v714_v42 = vld [vmem:[%s1691_s3 + $0x40] sm:$0xff]  ;;  %v715_v43 = vld [vmem:[%s1691_s3 + $0x48] sm:$0xff]  ;;  %v716_v46 = vld [vmem:[%s1691_s3 + $0x50] sm:$0xff] }
   0xe   : > { %1111 = vmatprep.subr.bf16.mxu0 %v1110_v15  ;;  %s1064_s30 = sshll.u32 %s1695_s26, 3  ;;  %1167 = vmatprep.subr.bf16.mxu1 %v1217_v26  ;;  %v1131_v45 = vpack.c.bf16 %v715_v43, %v714_v42  ;;  %v717_v47 = vld [vmem:[%s1691_s3 + $0x58] sm:$0xff]  ;;  %v718_v50 = vld [vmem:[%s1691_s3 + $0x60] sm:$0xff]  ;;  %v719_v51 = vld [vmem:[%s1691_s3 + $0x68] sm:$0xff]  ;;  %v278_v43 = vlaneseq }
   0xf   : > { %s1313_s8 = scalar_lea.vmem %s1688_s0, %s1064_s30  ;;  %v1134_v49 = vpack.c.bf16 %v717_v47, %v716_v46  ;;  %v1137_v53 = vpack.c.bf16 %v719_v51, %v718_v50  ;;  %v720_v54 = vld [vmem:[%s1691_s3 + $0x70] sm:$0xff]  ;;  %v721_v55 = vld [vmem:[%s1691_s3 + $0x78] sm:$0xff]  ;;  %v722_v58 = vld [vmem:[%s1691_s3 + $0x80] sm:$0xff]  ;;  %s1619_s15 = scalar_lea.vmem %s1693_s5, %s1064_s30 }
  0x10   : > { %v228_v25 = vld [vmem:[%s1313_s8] sm:$0xff]  ;;  %v229_v32 = vld [vmem:[%s1313_s8 + $0x8] sm:$0xff]  ;;  %v230_v36 = vld [vmem:[%s1313_s8 + $0x10] sm:$0xff]  ;;  %v1140_v57 = vpack.c.bf16 %v721_v55, %v720_v54 }
  0x11   : > { %1113 = vmatpush1.bf16.msra.mxu0 %v1112_v20  ;;  %1183 = vmatpush1.bf16.msra.mxu1 %v1122_v33  ;;  %v231_v40 = vld [vmem:[%s1313_s8 + $0x18] sm:$0xff]  ;;  %v232_v44 = vld [vmem:[%s1313_s8 + $0x20] sm:$0xff]  ;;  %v233_v48 = vld [vmem:[%s1313_s8 + $0x28] sm:$0xff] }
  0x12   : > { %1115 = vmatprep.subr.bf16.mxu0 %v1114_v21  ;;  %1168 = vmatprep.subr.bf16.mxu1 %v1217_v26  ;;  %v234_v52 = vld [vmem:[%s1313_s8 + $0x30] sm:$0xff]  ;;  %v235_v56 = vld [vmem:[%s1313_s8 + $0x38] sm:$0xff]  ;;  %v723_v59 = vld [vmem:[%s1691_s3 + $0x88] sm:$0xff] }
  0x13   : > { %v236_v60 = vld [vmem:[%s1313_s8 + $0x40] sm:$0xff]  ;;  %v1143_v61 = vpack.c.bf16 %v723_v59, %v722_v58  ;;  %v724_v62 = vld [vmem:[%s1691_s3 + $0x90] sm:$0xff]  ;;  %v725_v63 = vld [vmem:[%s1691_s3 + $0x98] sm:$0xff] }
  0x14   : > { %v237_v0 = vld [vmem:[%s1313_s8 + $0x48] sm:$0xff]  ;;  %v1146_v1 = vpack.c.bf16 %v725_v63, %v724_v62  ;;  %v726_v2 = vld [vmem:[%s1691_s3 + $0xa0] sm:$0xff]  ;;  %v238_v4 = vld [vmem:[%s1313_s8 + $0x50] sm:$0xff] }
  0x15   : > { %1117 = vmatpush1.bf16.msra.mxu0 %v1116_v24  ;;  %1184 = vmatpush1.bf16.msra.mxu1 %v1125_v37  ;;  %v727_v3 = vld [vmem:[%s1691_s3 + $0xa8] sm:$0xff]  ;;  %v728_v6 = vld [vmem:[%s1691_s3 + $0xb0] sm:$0xff]  ;;  %v729_v8 = vld [vmem:[%s1691_s3 + $0xb8] sm:$0xff] }
  0x16   : > { %1118 = vmatprep.subr.bf16.mxu0 %v1217_v26  ;;  %1169 = vmatprep.subr.bf16.mxu1 %v1217_v26  ;;  %v1149_v5 = vpack.c.bf16 %v727_v3, %v726_v2  ;;  %v239_v9 = vld [vmem:[%s1313_s8 + $0x58] sm:$0xff]  ;;  %v1152_v10 = vpack.c.bf16 %v729_v8, %v728_v6  ;;  %v730_v11 = vld [vmem:[%s1691_s3 + $0xc0] sm:$0xff]  ;;  %v731_v12 = vld [vmem:[%s1691_s3 + $0xc8] sm:$0xff] }
  0x17   : > { %v240_v13 = vld [vmem:[%s1313_s8 + $0x60] sm:$0xff]  ;;  %v1155_v14 = vpack.c.bf16 %v731_v12, %v730_v11  ;;  %v732_v15 = vld [vmem:[%s1691_s3 + $0xd0] sm:$0xff]  ;;  %v733_v16 = vld [vmem:[%s1691_s3 + $0xd8] sm:$0xff] }
  0x18   : > { %1067 = vmatmul.mubr.msk.f32.vlgmr.msra.gmra.mrb[0].mxu0 %vm288_vm0, %v228_v25  ;;  %v241_v17 = vld [vmem:[%s1313_s8 + $0x68] sm:$0xff]  ;;  %v1158_v18 = vpack.c.bf16 %v733_v16, %v732_v15  ;;  %v242_v19 = vld [vmem:[%s1313_s8 + $0x70] sm:$0xff]  ;;  %v243_v20 = vld [vmem:[%s1313_s8 + $0x78] sm:$0xff] }
  0x19   : > { %455 = vmatprep.mubr.f32.mxu0 %v1216_v7  ;;  %1120 = vmatpush1.bf16.msra.mxu0 %v1119_v31  ;;  %v244_v21 = vld [vmem:[%s1313_s8 + $0x80] sm:$0xff]  ;;  %v245_v22 = vld [vmem:[%s1313_s8 + $0x88] sm:$0xff]  ;;  %v246_v23 = vld [vmem:[%s1313_s8 + $0x90] sm:$0xff] }
  0x1a   : > { %1121 = vmatprep.subr.bf16.mxu0 %v1217_v26  ;;  %1185 = vmatpush1.bf16.msra.mxu1 %v1128_v41  ;;  %v247_v24 = vld [vmem:[%s1313_s8 + $0x98] sm:$0xff]  ;;  %v248_v25 = vld [vmem:[%s1313_s8 + $0xa0] sm:$0xff]  ;;  %v735_v28 = vld [vmem:[%s1691_s3 + $0xe8] sm:$0xff] }
  0x1b   : > { %1170 = vmatprep.subr.bf16.mxu1 %v1217_v26  ;;  %v734_v27 = vld [vmem:[%s1691_s3 + $0xe0] sm:$0xff]  ;;  %v249_v29 = vld [vmem:[%s1313_s8 + $0xa8] sm:$0xff]  ;;  %v736_v31 = vld [vmem:[%s1691_s3 + $0xf0] sm:$0xff] }
  0x1c   : > { %1068 = vmatmul.mubr.msk.f32.gmra.mrb[2].mxu0 %vm288_vm0, %v229_v32  ;;  %v1161_v30 = vpack.c.bf16 %v735_v28, %v734_v27  ;;  %v737_v32 = vld [vmem:[%s1691_s3 + $0xf8] sm:$0xff]  ;;  %v256_v39 = vld [vmem:[%s1313_s8 + $0xe0] sm:$0xff] }
  0x1d   : > { %461 = vmatprep.mubr.f32.mxu0 %v1216_v7  ;;  %1123 = vmatpush1.bf16.msra.mxu0 %v1122_v33  ;;  %v250_v33 = vld [vmem:[%s1313_s8 + $0xb0] sm:$0xff]  ;;  %v1164_v34 = vpack.c.bf16 %v737_v32, %v736_v31  ;;  %v251_v35 = vld [vmem:[%s1313_s8 + $0xb8] sm:$0xff]  ;;  %v276_v46 = vld [vmem:[%s1690_s2] sm:$0x3] }
  0x1e   : > { %1124 = vmatprep.subr.bf16.mxu0 %v1217_v26  ;;  %1186 = vmatpush1.bf16.msra.mxu1 %v1131_v45  ;;  %v255_v38 = vld [vmem:[%s1313_s8 + $0xd8] sm:$0xff] }
  0x1f   : > { %1171 = vmatprep.subr.bf16.mxu1 %v1217_v26  ;;  %v259_v42 = vld [vmem:[%s1313_s8 + $0xf8] sm:$0xff] }
  0x20   : > { %1069 = vmatmul.mubr.msk.f32.gmra.mrb[4].mxu0 %vm288_vm0, %v230_v36  ;;  %v252_v36 = vld [vmem:[%s1313_s8 + $0xc0] sm:$0xff] }
  0x21   : > { %467 = vmatprep.mubr.f32.mxu0 %v1216_v7  ;;  %1126 = vmatpush1.bf16.msra.mxu0 %v1125_v37  ;;  %v254_v37 = vld [vmem:[%s1313_s8 + $0xd0] sm:$0xff] }
  0x22   : > { %1127 = vmatprep.subr.bf16.mxu0 %v1217_v26  ;;  %1187 = vmatpush1.bf16.msra.mxu1 %v1134_v49 }
  0x23   : > { %1172 = vmatprep.subr.bf16.mxu1 %v1217_v26 }
  0x24   : > { %1070 = vmatmul.mubr.msk.f32.gmra.mrb[6].mxu0 %vm288_vm0, %v231_v40  ;;  %v257_v40 = vld [vmem:[%s1313_s8 + $0xe8] sm:$0xff] }
  0x25   : > { %473 = vmatprep.mubr.f32.mxu0 %v1216_v7  ;;  %1129 = vmatpush1.bf16.msra.mxu0 %v1128_v41  ;;  %v258_v41 = vld [vmem:[%s1313_s8 + $0xf0] sm:$0xff] }
  0x26   : > { %1130 = vmatprep.subr.bf16.mxu0 %v1217_v26  ;;  %1188 = vmatpush1.bf16.msra.mxu1 %v1137_v53 }
  0x27   : > { %1173 = vmatprep.subr.bf16.mxu1 %v1217_v26 }
  0x28   : > { %1071 = vmatmul.mubr.msk.f32.gmra.mrb[8].mxu0 %vm288_vm0, %v232_v44  ;;  %v279_v44 = vshrl.u32 %v278_v43, 7 }
  0x29   : > { %479 = vmatprep.mubr.f32.mxu0 %v1216_v7  ;;  %1132 = vmatpush1.bf16.msra.mxu0 %v1131_v45 }
  0x2a   : > { %1133 = vmatprep.subr.bf16.mxu0 %v1217_v26  ;;  %1189 = vmatpush1.bf16.msra.mxu1 %v1140_v57  ;;  %v280_v45 = vsub.s32 0, %v279_v44  ;;  %v284_v47 = vsub.s32 1, %v279_v44 }
  0x2b   : > { %1174 = vmatprep.subr.bf16.mxu1 %v1217_v26 }
  0x2c   : > { %1072 = vmatmul.mubr.msk.f32.gmra.mrb[10].mxu0 %vm288_vm0, %v233_v48  ;;  %v1541_v48 = vrot.slane %v276_v46, %v280_v45 }
  0x2d   : > { %485 = vmatprep.mubr.f32.mxu0 %v1216_v7  ;;  %1135 = vmatpush1.bf16.msra.mxu0 %v1134_v49  ;;  %v1543_v49 = vrot.slane %v276_v46, %v284_v47 }
  0x2e   : > { %1136 = vmatprep.subr.bf16.mxu0 %v1217_v26  ;;  %1190 = vmatpush1.bf16.msra.mxu1 %v1143_v61 }
  0x2f   : > { %1175 = vmatprep.subr.bf16.mxu1 %v1217_v26 }
  0x30   : > { %1073 = vmatmul.mubr.msk.f32.gmra.mrb[12].mxu0 %vm288_vm0, %v234_v52 }
  0x31   : > { %491 = vmatprep.mubr.f32.mxu0 %v1216_v7  ;;  %1138 = vmatpush1.bf16.msra.mxu0 %v1137_v53 }
  0x32   : > { %1139 = vmatprep.subr.bf16.mxu0 %v1217_v26  ;;  %1191 = vmatpush1.bf16.msra.mxu1 %v1146_v1 }
  0x33   : > { %1176 = vmatprep.subr.bf16.mxu1 %v1217_v26 }
  0x34   : > { %1074 = vmatmul.mubr.msk.f32.gmra.mrb[14].mxu0 %vm288_vm0, %v235_v56 }
  0x35   : > { %497 = vmatprep.mubr.f32.mxu0 %v1216_v7  ;;  %1141 = vmatpush1.bf16.msra.mxu0 %v1140_v57 }
  0x36   : > { %1142 = vmatprep.subr.bf16.mxu0 %v1217_v26  ;;  %1192 = vmatpush1.bf16.msra.mxu1 %v1149_v5 }
  0x37   : > { %1177 = vmatprep.subr.bf16.mxu1 %v1217_v26 }
  0x38   : > { %1075 = vmatmul.mubr.msk.f32.gmra.mrb[16].mxu0 %vm288_vm0, %v236_v60 }
  0x39   : > { %503 = vmatprep.mubr.f32.mxu0 %v1216_v7  ;;  %1144 = vmatpush1.bf16.msra.mxu0 %v1143_v61 }
  0x3a   : > { %1145 = vmatprep.subr.bf16.mxu0 %v1217_v26  ;;  %1193 = vmatpush1.bf16.msra.mxu1 %v1152_v10 }
  0x3b   : > { %1178 = vmatprep.subr.bf16.mxu1 %v1217_v26 }
  0x3c   : > { %1076 = vmatmul.mubr.msk.f32.gmra.mrb[18].mxu0 %vm288_vm0, %v237_v0 }
  0x3d   : > { %509 = vmatprep.mubr.f32.mxu0 %v1216_v7  ;;  %1147 = vmatpush1.bf16.msra.mxu0 %v1146_v1 }
  0x3e   : > { %1148 = vmatprep.subr.bf16.mxu0 %v1217_v26  ;;  %1194 = vmatpush1.bf16.msra.mxu1 %v1155_v14 }
  0x3f   : > { %1179 = vmatprep.subr.bf16.mxu1 %v1217_v26 }
  0x40   : > { %1077 = vmatmul.mubr.msk.f32.gmra.mrb[20].mxu0 %vm288_vm0, %v238_v4 }
  0x41   : > { %515 = vmatprep.mubr.f32.mxu0 %v1216_v7  ;;  %1150 = vmatpush1.bf16.msra.mxu0 %v1149_v5 }
  0x42   : > { %1151 = vmatprep.subr.bf16.mxu0 %v1217_v26  ;;  %1195 = vmatpush1.bf16.msra.mxu1 %v1158_v18 }
  0x43   : > { %1180 = vmatprep.subr.bf16.mxu1 %v1217_v26 }
  0x44   : > { %1078 = vmatmul.mubr.msk.f32.gmra.mrb[22].mxu0 %vm288_vm0, %v239_v9 }
  0x45   : > { %521 = vmatprep.mubr.f32.mxu0 %v1216_v7  ;;  %1153 = vmatpush1.bf16.msra.mxu0 %v1152_v10 }
  0x46   : > { %1154 = vmatprep.subr.bf16.mxu0 %v1217_v26  ;;  %1196 = vmatpush1.bf16.msra.mxu1 %v1161_v30 }
  0x47   : > { %1181 = vmatprep.subr.bf16.mxu1 %v1217_v26 }
  0x48   : > { %1079 = vmatmul.mubr.msk.f32.gmra.mrb[24].mxu0 %vm288_vm0, %v240_v13 }
  0x49   : > { %527 = vmatprep.mubr.f32.mxu0 %v1216_v7  ;;  %1156 = vmatpush1.bf16.msra.mxu0 %v1155_v14 }
  0x4a   : > { %1157 = vmatprep.subr.bf16.mxu0 %v1217_v26  ;;  %1197 = vmatpush1.bf16.msra.mxu1 %v1164_v34 }
  0x4c   : > { %1080 = vmatmul.mubr.msk.f32.gmra.mrb[26].mxu0 %vm288_vm0, %v241_v17 }
  0x4d   : > { %533 = vmatprep.mubr.f32.mxu0 %v1216_v7  ;;  %1159 = vmatpush1.bf16.msra.mxu0 %v1158_v18 }
  0x4e   : > { %1160 = vmatprep.subr.bf16.mxu0 %v1217_v26 }
  0x50   : > { %1081 = vmatmul.mubr.msk.f32.gmra.mrb[28].mxu0 %vm288_vm0, %v242_v19 }
  0x51   : > { %539 = vmatprep.mubr.f32.mxu0 %v1216_v7  ;;  %1162 = vmatpush1.bf16.msra.mxu0 %v1161_v30 }
  0x52   : > { %1163 = vmatprep.subr.bf16.mxu0 %v1217_v26  ;;  %v253_v26 = vld [vmem:[%s1313_s8 + $0xc8] sm:$0xff] }
  0x54   : > { %1082 = vmatmul.mubr.msk.f32.gmra.mrb[30].mxu0 %vm288_vm0, %v243_v20 }
  0x55   : > { %545 = vmatprep.mubr.f32.mxu0 %v1216_v7  ;;  %1165 = vmatpush1.bf16.msra.mxu0 %v1164_v34 }
  0x58   : > { %1083 = vmatmul.mubr.msk.f32.gmra.mrb[32].mxu0 %vm288_vm0, %v244_v21 }
  0x59   : > { %551 = vmatprep.mubr.f32.mxu0 %v1216_v7 }
  0x5c   : > { %1084 = vmatmul.mubr.msk.f32.gmra.mrb[34].mxu0 %vm288_vm0, %v245_v22 }
  0x5d   : > { %557 = vmatprep.mubr.f32.mxu0 %v1216_v7 }
  0x60   : > { %1085 = vmatmul.mubr.msk.f32.gmra.mrb[36].mxu0 %vm288_vm0, %v246_v23 }
  0x61   : > { %563 = vmatprep.mubr.f32.mxu0 %v1216_v7 }
  0x64   : > { %1086 = vmatmul.mubr.msk.f32.gmra.mrb[38].mxu0 %vm288_vm0, %v247_v24 }
  0x65   : > { %569 = vmatprep.mubr.f32.mxu0 %v1216_v7 }
  0x68   : > { %1087 = vmatmul.mubr.msk.f32.gmra.mrb[40].mxu0 %vm288_vm0, %v248_v25 }
  0x69   : > { %575 = vmatprep.mubr.f32.mxu0 %v1216_v7 }
  0x6c   : > { %1088 = vmatmul.mubr.msk.f32.gmra.mrb[42].mxu0 %vm288_vm0, %v249_v29 }
  0x6d   : > { %581 = vmatprep.mubr.f32.mxu0 %v1216_v7 }
  0x70   : > { %1089 = vmatmul.mubr.msk.f32.gmra.mrb[44].mxu0 %vm288_vm0, %v250_v33 }
  0x71   : > { %587 = vmatprep.mubr.f32.mxu0 %v1216_v7 }
  0x74   : > { %1090 = vmatmul.mubr.msk.f32.gmra.mrb[46].mxu0 %vm288_vm0, %v251_v35 }
  0x75   : > { %593 = vmatprep.mubr.f32.mxu0 %v1216_v7 }
  0x78   : > { %1091 = vmatmul.mubr.msk.f32.gmra.mrb[48].mxu0 %vm288_vm0, %v252_v36 }
  0x79   : > { %599 = vmatprep.mubr.f32.mxu0 %v1216_v7 }
  0x7c   : > { %1092 = vmatmul.mubr.msk.f32.gmra.mrb[50].mxu0 %vm288_vm0, %v253_v26 }
  0x7d   : > { %605 = vmatprep.mubr.f32.mxu0 %v1216_v7 }
  0x80   : > { %1093 = vmatmul.mubr.msk.f32.gmra.mrb[52].mxu0 %vm288_vm0, %v254_v37 }
  0x81   : > { %611 = vmatprep.mubr.f32.mxu0 %v1216_v7 }
  0x84   : > { %1094 = vmatmul.mubr.msk.f32.gmra.mrb[54].mxu0 %vm288_vm0, %v255_v38 }
  0x85   : > { %617 = vmatprep.mubr.f32.mxu0 %v1216_v7 }
  0x88   : > { %1095 = vmatmul.mubr.msk.f32.gmra.mrb[56].mxu0 %vm288_vm0, %v256_v39 }
  0x89   : > { %623 = vmatprep.mubr.f32.mxu0 %v1216_v7 }
  0x8c   : > { %1096 = vmatmul.mubr.msk.f32.gmra.mrb[58].mxu0 %vm288_vm0, %v257_v40 }
  0x8d   : > { %629 = vmatprep.mubr.f32.mxu0 %v1216_v7 }
  0x90   : > { %1097 = vmatmul.mubr.msk.f32.gmra.mrb[60].mxu0 %vm288_vm0, %v258_v41 }
  0x91   : > { %635 = vmatprep.mubr.f32.mxu0 %v1216_v7 }
  0x94   : > { %1098 = vmatmul.mubr.msk.f32.gmra.mrb[62].mxu0 %vm288_vm0, %v259_v42 }
  0xeb   : > { %v451_v50 = vpop.f32.mrb[0].mxu0 }
  0xec   : > { %v452_v51 = vadd.f32 %v451_v50, %v1541_v48  ;;  %v453_v52 = vpop.f32.mrb[1].mxu0 }
  0xed   : > { %v454_v7 = vadd.f32 %v453_v52, %v1543_v49 }
  0xee   : > { %v642_v55 = vmax.f32 %v452_v51, 0.0 }
  0xef   : > { %v643_v53 = vmax.f32 %v454_v7, 0.0  ;;  %v457_v54 = vpop.f32.mrb[2].mxu0 }
  0xf0   : > { %v458_v56 = vadd.f32 %v457_v54, %v1541_v48  ;;  %v459_v57 = vpop.f32.mrb[3].mxu0 }
  0xf1   : > { %v460_v58 = vadd.f32 %v459_v57, %v1543_v49  ;;  %809 = vmatprep.mubr.f32.mxu0 %v643_v53 }
  0xf2   : > { %810 = vmatmul.mubr.f32.vlgmr.msra.gmra.mrb[64].mxu0 %v642_v55  ;;  %v644_v61 = vmax.f32 %v458_v56, 0.0 }
  0xf3   : > { %v645_v59 = vmax.f32 %v460_v58, 0.0  ;;  %v463_v60 = vpop.f32.mrb[4].mxu0 }
  0xf4   : > { %v464_v62 = vadd.f32 %v463_v60, %v1541_v48  ;;  %v465_v63 = vpop.f32.mrb[5].mxu0 }
  0xf5   : > { %v466_v0 = vadd.f32 %v465_v63, %v1543_v49  ;;  %814 = vmatprep.mubr.f32.mxu0 %v645_v59 }
  0xf6   : > { %815 = vmatmul.mubr.f32.gmra.mrb[66].mxu0 %v644_v61  ;;  %v646_v3 = vmax.f32 %v464_v62, 0.0 }
  0xf7   : > { %v647_v1 = vmax.f32 %v466_v0, 0.0  ;;  %v469_v2 = vpop.f32.mrb[6].mxu0 }
  0xf8   : > { %v470_v4 = vadd.f32 %v469_v2, %v1541_v48  ;;  %v471_v5 = vpop.f32.mrb[7].mxu0 }
  0xf9   : > { %v472_v6 = vadd.f32 %v471_v5, %v1543_v49  ;;  %819 = vmatprep.mubr.f32.mxu0 %v647_v1 }
  0xfa   : > { %820 = vmatmul.mubr.f32.gmra.mrb[68].mxu0 %v646_v3  ;;  %v648_v10 = vmax.f32 %v470_v4, 0.0 }
  0xfb   : > { %v649_v8 = vmax.f32 %v472_v6, 0.0  ;;  %v475_v9 = vpop.f32.mrb[8].mxu0 }
  0xfc   : > { %v476_v11 = vadd.f32 %v475_v9, %v1541_v48  ;;  %v477_v12 = vpop.f32.mrb[9].mxu0 }
  0xfd   : > { %v478_v13 = vadd.f32 %v477_v12, %v1543_v49  ;;  %824 = vmatprep.mubr.f32.mxu0 %v649_v8 }
  0xfe   : > { %825 = vmatmul.mubr.f32.gmra.mrb[70].mxu0 %v648_v10  ;;  %v650_v16 = vmax.f32 %v476_v11, 0.0 }
  0xff   : > { %v651_v14 = vmax.f32 %v478_v13, 0.0  ;;  %v481_v15 = vpop.f32.mrb[10].mxu0 }
 0x100   : > { %v482_v17 = vadd.f32 %v481_v15, %v1541_v48  ;;  %v483_v18 = vpop.f32.mrb[11].mxu0 }
 0x101   : > { %v484_v19 = vadd.f32 %v483_v18, %v1543_v49  ;;  %829 = vmatprep.mubr.f32.mxu0 %v651_v14 }
 0x102   : > { %830 = vmatmul.mubr.f32.gmra.mrb[72].mxu0 %v650_v16  ;;  %v652_v22 = vmax.f32 %v482_v17, 0.0 }
 0x103   : > { %v653_v20 = vmax.f32 %v484_v19, 0.0  ;;  %v487_v21 = vpop.f32.mrb[12].mxu0 }
 0x104   : > { %v488_v23 = vadd.f32 %v487_v21, %v1541_v48  ;;  %v489_v24 = vpop.f32.mrb[13].mxu0 }
 0x105   : > { %834 = vmatprep.mubr.f32.mxu0 %v653_v20  ;;  %v490_v25 = vadd.f32 %v489_v24, %v1543_v49 }
 0x106   : > { %835 = vmatmul.mubr.f32.gmra.mrb[74].mxu0 %v652_v22  ;;  %v654_v29 = vmax.f32 %v488_v23, 0.0 }
 0x107   : > { %v493_v27 = vpop.f32.mrb[14].mxu0  ;;  %v655_v28 = vmax.f32 %v490_v25, 0.0 }
 0x108   : > { %v494_v30 = vadd.f32 %v493_v27, %v1541_v48  ;;  %v495_v31 = vpop.f32.mrb[15].mxu0 }
 0x109   : > { %v496_v32 = vadd.f32 %v495_v31, %v1543_v49  ;;  %839 = vmatprep.mubr.f32.mxu1 %v655_v28 }
 0x10a   : > { %840 = vmatmul.mubr.f32.vlgmr.msra.gmra.mrb[0].mxu1 %v654_v29  ;;  %v656_v35 = vmax.f32 %v494_v30, 0.0 }
 0x10b   : > { %v657_v33 = vmax.f32 %v496_v32, 0.0  ;;  %v499_v34 = vpop.f32.mrb[16].mxu0 }
 0x10c   : > { %v500_v36 = vadd.f32 %v499_v34, %v1541_v48  ;;  %v501_v26 = vpop.f32.mrb[17].mxu0 }
 0x10d   : > { %v502_v37 = vadd.f32 %v501_v26, %v1543_v49  ;;  %844 = vmatprep.mubr.f32.mxu1 %v657_v33 }
 0x10e   : > { %845 = vmatmul.mubr.f32.gmra.mrb[2].mxu1 %v656_v35  ;;  %v658_v40 = vmax.f32 %v500_v36, 0.0 }
 0x10f   : > { %v659_v38 = vmax.f32 %v502_v37, 0.0  ;;  %v505_v39 = vpop.f32.mrb[18].mxu0 }
 0x110   : > { %v506_v41 = vadd.f32 %v505_v39, %v1541_v48  ;;  %v507_v42 = vpop.f32.mrb[19].mxu0 }
 0x111   : > { %v508_v43 = vadd.f32 %v507_v42, %v1543_v49  ;;  %849 = vmatprep.mubr.f32.mxu1 %v659_v38 }
 0x112   : > { %850 = vmatmul.mubr.f32.gmra.mrb[4].mxu1 %v658_v40  ;;  %v660_v46 = vmax.f32 %v506_v41, 0.0 }
 0x113   : > { %v661_v44 = vmax.f32 %v508_v43, 0.0  ;;  %v511_v45 = vpop.f32.mrb[20].mxu0 }
 0x114   : > { %v512_v47 = vadd.f32 %v511_v45, %v1541_v48  ;;  %v513_v50 = vpop.f32.mrb[21].mxu0 }
 0x115   : > { %v514_v51 = vadd.f32 %v513_v50, %v1543_v49  ;;  %854 = vmatprep.mubr.f32.mxu1 %v661_v44 }
 0x116   : > { %855 = vmatmul.mubr.f32.gmra.mrb[6].mxu1 %v660_v46  ;;  %v662_v53 = vmax.f32 %v512_v47, 0.0 }
 0x117   : > { %v663_v52 = vmax.f32 %v514_v51, 0.0  ;;  %v517_v7 = vpop.f32.mrb[22].mxu0 }
 0x118   : > { %v518_v54 = vadd.f32 %v517_v7, %v1541_v48  ;;  %v519_v55 = vpop.f32.mrb[23].mxu0 }
 0x119   : > { %v520_v56 = vadd.f32 %v519_v55, %v1543_v49  ;;  %859 = vmatprep.mubr.f32.mxu1 %v663_v52 }
 0x11a   : > { %860 = vmatmul.mubr.f32.gmra.mrb[8].mxu1 %v662_v53  ;;  %v664_v59 = vmax.f32 %v518_v54, 0.0 }
 0x11b   : > { %v665_v57 = vmax.f32 %v520_v56, 0.0  ;;  %v523_v58 = vpop.f32.mrb[24].mxu0 }
 0x11c   : > { %v524_v60 = vadd.f32 %v523_v58, %v1541_v48  ;;  %v525_v61 = vpop.f32.mrb[25].mxu0 }
 0x11d   : > { %v526_v62 = vadd.f32 %v525_v61, %v1543_v49  ;;  %864 = vmatprep.mubr.f32.mxu1 %v665_v57 }
 0x11e   : > { %865 = vmatmul.mubr.f32.gmra.mrb[10].mxu1 %v664_v59  ;;  %v666_v1 = vmax.f32 %v524_v60, 0.0 }
 0x11f   : > { %v667_v63 = vmax.f32 %v526_v62, 0.0  ;;  %v529_v0 = vpop.f32.mrb[26].mxu0 }
 0x120   : > { %v530_v2 = vadd.f32 %v529_v0, %v1541_v48  ;;  %v531_v3 = vpop.f32.mrb[27].mxu0 }
 0x121   : > { %v532_v4 = vadd.f32 %v531_v3, %v1543_v49  ;;  %869 = vmatprep.mubr.f32.mxu1 %v667_v63 }
 0x122   : > { %870 = vmatmul.mubr.f32.gmra.mrb[12].mxu1 %v666_v1  ;;  %v668_v8 = vmax.f32 %v530_v2, 0.0 }
 0x123   : > { %v669_v5 = vmax.f32 %v532_v4, 0.0  ;;  %v535_v6 = vpop.f32.mrb[28].mxu0 }
 0x124   : > { %v536_v9 = vadd.f32 %v535_v6, %v1541_v48  ;;  %v537_v10 = vpop.f32.mrb[29].mxu0 }
 0x125   : > { %v538_v11 = vadd.f32 %v537_v10, %v1543_v49  ;;  %874 = vmatprep.mubr.f32.mxu1 %v669_v5 }
 0x126   : > { %875 = vmatmul.mubr.f32.gmra.mrb[14].mxu1 %v668_v8  ;;  %v670_v14 = vmax.f32 %v536_v9, 0.0 }
 0x127   : > { %v671_v12 = vmax.f32 %v538_v11, 0.0  ;;  %v541_v13 = vpop.f32.mrb[30].mxu0 }
 0x128   : > { %v542_v15 = vadd.f32 %v541_v13, %v1541_v48  ;;  %v543_v16 = vpop.f32.mrb[31].mxu0 }
 0x129   : > { %v544_v17 = vadd.f32 %v543_v16, %v1543_v49  ;;  %879 = vmatprep.mubr.f32.mxu1 %v671_v12 }
 0x12a   : > { %880 = vmatmul.mubr.f32.gmra.mrb[16].mxu1 %v670_v14  ;;  %v672_v20 = vmax.f32 %v542_v15, 0.0 }
 0x12b   : > { %v673_v18 = vmax.f32 %v544_v17, 0.0  ;;  %v547_v19 = vpop.f32.mrb[32].mxu0 }
 0x12c   : > { %v548_v21 = vadd.f32 %v547_v19, %v1541_v48  ;;  %v549_v22 = vpop.f32.mrb[33].mxu0 }
 0x12d   : > { %v550_v23 = vadd.f32 %v549_v22, %v1543_v49  ;;  %884 = vmatprep.mubr.f32.mxu1 %v673_v18 }
 0x12e   : > { %885 = vmatmul.mubr.f32.gmra.mrb[18].mxu1 %v672_v20  ;;  %v674_v27 = vmax.f32 %v548_v21, 0.0 }
 0x12f   : > { %v675_v24 = vmax.f32 %v550_v23, 0.0  ;;  %v553_v25 = vpop.f32.mrb[34].mxu0 }
 0x130   : > { %v554_v28 = vadd.f32 %v553_v25, %v1541_v48  ;;  %v555_v29 = vpop.f32.mrb[35].mxu0 }
 0x131   : > { %v556_v30 = vadd.f32 %v555_v29, %v1543_v49  ;;  %889 = vmatprep.mubr.f32.mxu1 %v675_v24 }
 0x132   : > { %890 = vmatmul.mubr.f32.gmra.mrb[20].mxu1 %v674_v27  ;;  %v676_v33 = vmax.f32 %v554_v28, 0.0 }
 0x133   : > { %v677_v31 = vmax.f32 %v556_v30, 0.0  ;;  %v559_v32 = vpop.f32.mrb[36].mxu0 }
 0x134   : > { %v560_v34 = vadd.f32 %v559_v32, %v1541_v48  ;;  %v561_v35 = vpop.f32.mrb[37].mxu0 }
 0x135   : > { %v562_v36 = vadd.f32 %v561_v35, %v1543_v49  ;;  %894 = vmatprep.mubr.f32.mxu1 %v677_v31 }
 0x136   : > { %895 = vmatmul.mubr.f32.gmra.mrb[22].mxu1 %v676_v33  ;;  %v678_v38 = vmax.f32 %v560_v34, 0.0 }
 0x137   : > { %v679_v26 = vmax.f32 %v562_v36, 0.0  ;;  %v565_v37 = vpop.f32.mrb[38].mxu0 }
 0x138   : > { %v566_v39 = vadd.f32 %v565_v37, %v1541_v48  ;;  %v567_v40 = vpop.f32.mrb[39].mxu0 }
 0x139   : > { %v568_v41 = vadd.f32 %v567_v40, %v1543_v49  ;;  %899 = vmatprep.mubr.f32.mxu1 %v679_v26 }
 0x13a   : > { %900 = vmatmul.mubr.f32.gmra.mrb[24].mxu1 %v678_v38  ;;  %v680_v44 = vmax.f32 %v566_v39, 0.0 }
 0x13b   : > { %v681_v42 = vmax.f32 %v568_v41, 0.0  ;;  %v571_v43 = vpop.f32.mrb[40].mxu0 }
 0x13c   : > { %v572_v45 = vadd.f32 %v571_v43, %v1541_v48  ;;  %v573_v46 = vpop.f32.mrb[41].mxu0 }
 0x13d   : > { %v574_v47 = vadd.f32 %v573_v46, %v1543_v49  ;;  %904 = vmatprep.mubr.f32.mxu1 %v681_v42 }
 0x13e   : > { %905 = vmatmul.mubr.f32.gmra.mrb[26].mxu1 %v680_v44  ;;  %v682_v52 = vmax.f32 %v572_v45, 0.0 }
 0x13f   : > { %v683_v50 = vmax.f32 %v574_v47, 0.0  ;;  %v577_v51 = vpop.f32.mrb[42].mxu0 }
 0x140   : > { %v578_v7 = vadd.f32 %v577_v51, %v1541_v48  ;;  %v579_v53 = vpop.f32.mrb[43].mxu0 }
 0x141   : > { %v580_v54 = vadd.f32 %v579_v53, %v1543_v49  ;;  %909 = vmatprep.mubr.f32.mxu1 %v683_v50 }
 0x142   : > { %910 = vmatmul.mubr.f32.gmra.mrb[28].mxu1 %v682_v52  ;;  %v684_v57 = vmax.f32 %v578_v7, 0.0 }
 0x143   : > { %v685_v55 = vmax.f32 %v580_v54, 0.0  ;;  %v583_v56 = vpop.f32.mrb[44].mxu0 }
 0x144   : > { %v584_v58 = vadd.f32 %v583_v56, %v1541_v48  ;;  %v585_v59 = vpop.f32.mrb[45].mxu0 }
 0x145   : > { %v586_v60 = vadd.f32 %v585_v59, %v1543_v49  ;;  %914 = vmatprep.mubr.f32.mxu1 %v685_v55  ;;  %v1612_v55 = vld [vmem:[%s1692_s4] ss:$0 sm:$0xff] }
 0x146   : > { %915 = vmatmul.mubr.f32.gmra.mrb[30].mxu1 %v684_v57  ;;  %v686_v63 = vmax.f32 %v584_v58, 0.0 }
 0x147   : > { %v687_v61 = vmax.f32 %v586_v60, 0.0  ;;  %v589_v62 = vpop.f32.mrb[46].mxu0 }
 0x148   : > { %v590_v0 = vadd.f32 %v589_v62, %v1541_v48  ;;  %v591_v1 = vpop.f32.mrb[47].mxu0 }
 0x149   : > { %v592_v2 = vadd.f32 %v591_v1, %v1543_v49  ;;  %919 = vmatprep.mubr.f32.mxu1 %v687_v61 }
 0x14a   : > { %920 = vmatmul.mubr.f32.gmra.mrb[32].mxu1 %v686_v63  ;;  %v688_v5 = vmax.f32 %v590_v0, 0.0 }
 0x14b   : > { %v689_v3 = vmax.f32 %v592_v2, 0.0  ;;  %v595_v4 = vpop.f32.mrb[48].mxu0 }
 0x14c   : > { %v596_v6 = vadd.f32 %v595_v4, %v1541_v48  ;;  %v597_v8 = vpop.f32.mrb[49].mxu0 }
 0x14d   : > { %v598_v9 = vadd.f32 %v597_v8, %v1543_v49  ;;  %924 = vmatprep.mubr.f32.mxu1 %v689_v3 }
 0x14e   : > { %925 = vmatmul.mubr.f32.gmra.mrb[34].mxu1 %v688_v5  ;;  %v690_v12 = vmax.f32 %v596_v6, 0.0 }
 0x14f   : > { %v691_v10 = vmax.f32 %v598_v9, 0.0  ;;  %v601_v11 = vpop.f32.mrb[50].mxu0 }
 0x150   : > { %v602_v13 = vadd.f32 %v601_v11, %v1541_v48  ;;  %v603_v14 = vpop.f32.mrb[51].mxu0 }
 0x151   : > { %v604_v15 = vadd.f32 %v603_v14, %v1543_v49  ;;  %929 = vmatprep.mubr.f32.mxu1 %v691_v10 }
 0x152   : > { %930 = vmatmul.mubr.f32.gmra.mrb[36].mxu1 %v690_v12  ;;  %v692_v18 = vmax.f32 %v602_v13, 0.0 }
 0x153   : > { %v693_v16 = vmax.f32 %v604_v15, 0.0  ;;  %v607_v17 = vpop.f32.mrb[52].mxu0 }
 0x154   : > { %v608_v19 = vadd.f32 %v607_v17, %v1541_v48  ;;  %v609_v20 = vpop.f32.mrb[53].mxu0 }
 0x155   : > { %v610_v21 = vadd.f32 %v609_v20, %v1543_v49  ;;  %934 = vmatprep.mubr.f32.mxu1 %v693_v16 }
 0x156   : > { %935 = vmatmul.mubr.f32.gmra.mrb[38].mxu1 %v692_v18  ;;  %v694_v24 = vmax.f32 %v608_v19, 0.0 }
 0x157   : > { %v695_v22 = vmax.f32 %v610_v21, 0.0  ;;  %v613_v23 = vpop.f32.mrb[54].mxu0 }
 0x158   : > { %v614_v25 = vadd.f32 %v613_v23, %v1541_v48  ;;  %v615_v27 = vpop.f32.mrb[55].mxu0 }
 0x159   : > { %v616_v28 = vadd.f32 %v615_v27, %v1543_v49  ;;  %939 = vmatprep.mubr.f32.mxu1 %v695_v22 }
 0x15a   : > { %940 = vmatmul.mubr.f32.gmra.mrb[40].mxu1 %v694_v24  ;;  %v696_v31 = vmax.f32 %v614_v25, 0.0 }
 0x15b   : > { %v697_v29 = vmax.f32 %v616_v28, 0.0  ;;  %v619_v30 = vpop.f32.mrb[56].mxu0 }
 0x15c   : > { %v620_v32 = vadd.f32 %v619_v30, %v1541_v48  ;;  %v621_v33 = vpop.f32.mrb[57].mxu0 }
 0x15d   : > { %v622_v34 = vadd.f32 %v621_v33, %v1543_v49  ;;  %944 = vmatprep.mubr.f32.mxu1 %v697_v29 }
 0x15e   : > { %945 = vmatmul.mubr.f32.gmra.mrb[42].mxu1 %v696_v31  ;;  %v698_v26 = vmax.f32 %v620_v32, 0.0 }
 0x15f   : > { %v699_v35 = vmax.f32 %v622_v34, 0.0  ;;  %v625_v36 = vpop.f32.mrb[58].mxu0 }
 0x160   : > { %v626_v37 = vadd.f32 %v625_v36, %v1541_v48  ;;  %v627_v38 = vpop.f32.mrb[59].mxu0 }
 0x161   : > { %v628_v39 = vadd.f32 %v627_v38, %v1543_v49  ;;  %949 = vmatprep.mubr.f32.mxu1 %v699_v35 }
 0x162   : > { %950 = vmatmul.mubr.f32.gmra.mrb[44].mxu1 %v698_v26  ;;  %v700_v42 = vmax.f32 %v626_v37, 0.0 }
 0x163   : > { %v701_v40 = vmax.f32 %v628_v39, 0.0  ;;  %v631_v41 = vpop.f32.mrb[60].mxu0 }
 0x164   : > { %v632_v43 = vadd.f32 %v631_v41, %v1541_v48  ;;  %v633_v44 = vpop.f32.mrb[61].mxu0 }
 0x165   : > { %v634_v45 = vadd.f32 %v633_v44, %v1543_v49  ;;  %954 = vmatprep.mubr.f32.mxu1 %v701_v40 }
 0x166   : > { %955 = vmatmul.mubr.f32.gmra.mrb[46].mxu1 %v700_v42  ;;  %v702_v50 = vmax.f32 %v632_v43, 0.0 }
 0x167   : > { %v703_v46 = vmax.f32 %v634_v45, 0.0  ;;  %v637_v47 = vpop.f32.mrb[62].mxu0 }
 0x168   : > { %v638_v51 = vadd.f32 %v637_v47, %v1541_v48  ;;  %v639_v52 = vpop.f32.mrb[63].mxu0 }
 0x169   : > { %v640_v7 = vadd.f32 %v639_v52, %v1543_v49  ;;  %959 = vmatprep.mubr.f32.mxu1 %v703_v46 }
 0x16a   : > { %960 = vmatmul.mubr.f32.gmra.mrb[48].mxu1 %v702_v50  ;;  %v704_v54 = vmax.f32 %v638_v51, 0.0 }
 0x16b   : > { %v705_v53 = vmax.f32 %v640_v7, 0.0 }
 0x16d   : > { %964 = vmatprep.mubr.f32.mxu1 %v705_v53 }
 0x16e   : > { %965 = vmatmul.mubr.f32.gmra.mrb[50].mxu1 %v704_v54 }
 0x1c5   : > { %v811_v48 = vpop.f32.mrb[64].mxu0 }
 0x1c6   : > { %v812_v49 = vadd.f32 %v1612_v55, %v811_v48  ;;  %v813_v56 = vpop.f32.mrb[65].mxu0 }
 0x1c8   : > { %970 = vst [vmem:[%s1619_s15] sm:$0xff] %v812_v49 }
 0x1c9   : > { %v816_v57 = vpop.f32.mrb[66].mxu0 }
 0x1ca   : > { %v817_v58 = vadd.f32 %v1612_v55, %v816_v57  ;;  %v818_v59 = vpop.f32.mrb[67].mxu0 }
 0x1cc   : > { %971 = vst [vmem:[%s1619_s15 + $0x8] sm:$0xff] %v817_v58 }
 0x1cd   : > { %v821_v60 = vpop.f32.mrb[68].mxu0 }
 0x1ce   : > { %v822_v61 = vadd.f32 %v1612_v55, %v821_v60  ;;  %v823_v62 = vpop.f32.mrb[69].mxu0 }
 0x1d0   : > { %972 = vst [vmem:[%s1619_s15 + $0x10] sm:$0xff] %v822_v61 }
 0x1d1   : > { %v826_v63 = vpop.f32.mrb[70].mxu0 }
 0x1d2   : > { %v827_v0 = vadd.f32 %v1612_v55, %v826_v63  ;;  %v828_v1 = vpop.f32.mrb[71].mxu0 }
 0x1d4   : > { %973 = vst [vmem:[%s1619_s15 + $0x18] sm:$0xff] %v827_v0 }
 0x1d5   : > { %v831_v2 = vpop.f32.mrb[72].mxu0 }
 0x1d6   : > { %v832_v3 = vadd.f32 %v1612_v55, %v831_v2  ;;  %v833_v4 = vpop.f32.mrb[73].mxu0 }
 0x1d8   : > { %974 = vst [vmem:[%s1619_s15 + $0x20] sm:$0xff] %v832_v3 }
 0x1d9   : > { %v836_v5 = vpop.f32.mrb[74].mxu0 }
 0x1da   : > { %v837_v6 = vadd.f32 %v1612_v55, %v836_v5  ;;  %v838_v8 = vpop.f32.mrb[75].mxu0 }
 0x1dc   : > { %975 = vst [vmem:[%s1619_s15 + $0x28] sm:$0xff] %v837_v6 }
 0x1dd   : > { %v841_v9 = vpop.f32.mrb[0].mxu1 }
 0x1de   : > { %v842_v10 = vadd.f32 %v1612_v55, %v841_v9  ;;  %v843_v11 = vpop.f32.mrb[1].mxu1 }
 0x1e0   : > { %976 = vst [vmem:[%s1619_s15 + $0x30] sm:$0xff] %v842_v10 }
 0x1e1   : > { %v846_v12 = vpop.f32.mrb[2].mxu1 }
 0x1e2   : > { %v847_v13 = vadd.f32 %v1612_v55, %v846_v12  ;;  %v848_v14 = vpop.f32.mrb[3].mxu1 }
 0x1e4   : > { %977 = vst [vmem:[%s1619_s15 + $0x38] sm:$0xff] %v847_v13 }
 0x1e5   : > { %v851_v15 = vpop.f32.mrb[4].mxu1 }
 0x1e6   : > { %v852_v16 = vadd.f32 %v1612_v55, %v851_v15  ;;  %v853_v17 = vpop.f32.mrb[5].mxu1 }
 0x1e8   : > { %978 = vst [vmem:[%s1619_s15 + $0x40] sm:$0xff] %v852_v16 }
 0x1e9   : > { %v856_v18 = vpop.f32.mrb[6].mxu1 }
 0x1ea   : > { %v857_v19 = vadd.f32 %v1612_v55, %v856_v18  ;;  %v858_v20 = vpop.f32.mrb[7].mxu1 }
 0x1ec   : > { %979 = vst [vmem:[%s1619_s15 + $0x48] sm:$0xff] %v857_v19 }
 0x1ed   : > { %v861_v21 = vpop.f32.mrb[8].mxu1 }
 0x1ee   : > { %v862_v22 = vadd.f32 %v1612_v55, %v861_v21  ;;  %v863_v23 = vpop.f32.mrb[9].mxu1 }
 0x1f0   : > { %980 = vst [vmem:[%s1619_s15 + $0x50] sm:$0xff] %v862_v22 }
 0x1f1   : > { %v866_v24 = vpop.f32.mrb[10].mxu1 }
 0x1f2   : > { %v867_v25 = vadd.f32 %v1612_v55, %v866_v24  ;;  %v868_v27 = vpop.f32.mrb[11].mxu1 }
 0x1f4   : > { %981 = vst [vmem:[%s1619_s15 + $0x58] sm:$0xff] %v867_v25 }
 0x1f5   : > { %v871_v28 = vpop.f32.mrb[12].mxu1 }
 0x1f6   : > { %v872_v29 = vadd.f32 %v1612_v55, %v871_v28  ;;  %v873_v30 = vpop.f32.mrb[13].mxu1 }
 0x1f8   : > { %982 = vst [vmem:[%s1619_s15 + $0x60] sm:$0xff] %v872_v29 }
 0x1f9   : > { %v876_v31 = vpop.f32.mrb[14].mxu1 }
 0x1fa   : > { %v877_v32 = vadd.f32 %v1612_v55, %v876_v31  ;;  %v878_v33 = vpop.f32.mrb[15].mxu1 }
 0x1fc   : > { %983 = vst [vmem:[%s1619_s15 + $0x68] sm:$0xff] %v877_v32 }
 0x1fd   : > { %v881_v34 = vpop.f32.mrb[16].mxu1 }
 0x1fe   : > { %v882_v35 = vadd.f32 %v1612_v55, %v881_v34  ;;  %v883_v36 = vpop.f32.mrb[17].mxu1 }
 0x200   : > { %984 = vst [vmem:[%s1619_s15 + $0x70] sm:$0xff] %v882_v35 }
 0x201   : > { %v886_v26 = vpop.f32.mrb[18].mxu1 }
 0x202   : > { %v887_v37 = vadd.f32 %v1612_v55, %v886_v26  ;;  %v888_v38 = vpop.f32.mrb[19].mxu1 }
 0x204   : > { %985 = vst [vmem:[%s1619_s15 + $0x78] sm:$0xff] %v887_v37 }
 0x205   : > { %v891_v39 = vpop.f32.mrb[20].mxu1 }
 0x206   : > { %v892_v40 = vadd.f32 %v1612_v55, %v891_v39  ;;  %v893_v41 = vpop.f32.mrb[21].mxu1 }
 0x208   : > { %986 = vst [vmem:[%s1619_s15 + $0x80] sm:$0xff] %v892_v40 }
 0x209   : > { %v896_v42 = vpop.f32.mrb[22].mxu1 }
 0x20a   : > { %v897_v43 = vadd.f32 %v1612_v55, %v896_v42  ;;  %v898_v44 = vpop.f32.mrb[23].mxu1 }
 0x20c   : > { %987 = vst [vmem:[%s1619_s15 + $0x88] sm:$0xff] %v897_v43 }
 0x20d   : > { %v901_v45 = vpop.f32.mrb[24].mxu1 }
 0x20e   : > { %v902_v46 = vadd.f32 %v1612_v55, %v901_v45  ;;  %v903_v47 = vpop.f32.mrb[25].mxu1 }
 0x210   : > { %988 = vst [vmem:[%s1619_s15 + $0x90] sm:$0xff] %v902_v46 }
 0x211   : > { %v906_v50 = vpop.f32.mrb[26].mxu1 }
 0x212   : > { %v907_v51 = vadd.f32 %v1612_v55, %v906_v50  ;;  %v908_v52 = vpop.f32.mrb[27].mxu1 }
 0x214   : > { %989 = vst [vmem:[%s1619_s15 + $0x98] sm:$0xff] %v907_v51 }
 0x215   : > { %v911_v7 = vpop.f32.mrb[28].mxu1 }
 0x216   : > { %v912_v53 = vadd.f32 %v1612_v55, %v911_v7  ;;  %v913_v54 = vpop.f32.mrb[29].mxu1 }
 0x218   : > { %990 = vst [vmem:[%s1619_s15 + $0xa0] sm:$0xff] %v912_v53 }
 0x219   : > { %v916_v48 = vpop.f32.mrb[30].mxu1 }
 0x21a   : > { %v917_v49 = vadd.f32 %v1612_v55, %v916_v48  ;;  %v918_v56 = vpop.f32.mrb[31].mxu1 }
 0x21c   : > { %991 = vst [vmem:[%s1619_s15 + $0xa8] sm:$0xff] %v917_v49 }
 0x21d   : > { %v921_v57 = vpop.f32.mrb[32].mxu1 }
 0x21e   : > { %v922_v58 = vadd.f32 %v1612_v55, %v921_v57  ;;  %v923_v59 = vpop.f32.mrb[33].mxu1 }
 0x220   : > { %992 = vst [vmem:[%s1619_s15 + $0xb0] sm:$0xff] %v922_v58 }
 0x221   : > { %v926_v60 = vpop.f32.mrb[34].mxu1 }
 0x222   : > { %v927_v61 = vadd.f32 %v1612_v55, %v926_v60  ;;  %v928_v62 = vpop.f32.mrb[35].mxu1 }
 0x224   : > { %993 = vst [vmem:[%s1619_s15 + $0xb8] sm:$0xff] %v927_v61 }
 0x225   : > { %v931_v63 = vpop.f32.mrb[36].mxu1 }
 0x226   : > { %v932_v0 = vadd.f32 %v1612_v55, %v931_v63  ;;  %v933_v1 = vpop.f32.mrb[37].mxu1 }
 0x228   : > { %994 = vst [vmem:[%s1619_s15 + $0xc0] sm:$0xff] %v932_v0 }
 0x229   : > { %v936_v2 = vpop.f32.mrb[38].mxu1 }
 0x22a   : > { %v937_v3 = vadd.f32 %v1612_v55, %v936_v2  ;;  %v938_v4 = vpop.f32.mrb[39].mxu1 }
 0x22c   : > { %995 = vst [vmem:[%s1619_s15 + $0xc8] sm:$0xff] %v937_v3 }
 0x22d   : > { %v941_v5 = vpop.f32.mrb[40].mxu1 }
 0x22e   : > { %v942_v6 = vadd.f32 %v1612_v55, %v941_v5  ;;  %v943_v8 = vpop.f32.mrb[41].mxu1 }
 0x230   : > { %996 = vst [vmem:[%s1619_s15 + $0xd0] sm:$0xff] %v942_v6 }
 0x231   : > { %v946_v9 = vpop.f32.mrb[42].mxu1 }
 0x232   : > { %v947_v10 = vadd.f32 %v1612_v55, %v946_v9  ;;  %v948_v11 = vpop.f32.mrb[43].mxu1 }
 0x234   : > { %997 = vst [vmem:[%s1619_s15 + $0xd8] sm:$0xff] %v947_v10 }
 0x235   : > { %v951_v12 = vpop.f32.mrb[44].mxu1 }
 0x236   : > { %v952_v13 = vadd.f32 %v1612_v55, %v951_v12  ;;  %v953_v14 = vpop.f32.mrb[45].mxu1 }
 0x238   : > { %998 = vst [vmem:[%s1619_s15 + $0xe0] sm:$0xff] %v952_v13 }
 0x239   : > { %v956_v15 = vpop.f32.mrb[46].mxu1 }
 0x23a   : > { %v957_v16 = vadd.f32 %v1612_v55, %v956_v15  ;;  %v958_v17 = vpop.f32.mrb[47].mxu1 }
 0x23c   : > { %999 = vst [vmem:[%s1619_s15 + $0xe8] sm:$0xff] %v957_v16 }
 0x23d   : > { %v961_v18 = vpop.f32.mrb[48].mxu1 }
 0x23e   : > { %v962_v19 = vadd.f32 %v1612_v55, %v961_v18  ;;  %v963_v20 = vpop.f32.mrb[49].mxu1 }
 0x240   : > { %1000 = vst [vmem:[%s1619_s15 + $0xf0] sm:$0xff] %v962_v19 }
 0x241   : > { %v966_v21 = vpop.f32.mrb[50].mxu1 }
 0x242   : > { %v967_v22 = vadd.f32 %v1612_v55, %v966_v21  ;;  %v968_v23 = vpop.f32.mrb[51].mxu1 }
 0x244   : > { %1001 = vst [vmem:[%s1619_s15 + $0xf8] sm:$0xff] %v967_v22 }
 0x245 PF: > { %s15_s18 = sadd.s32 1, %s1214_s18  }
 0x246   : > { %p12_p4 = scmp.ge.s32.totalorder %s15_s18, 4  }
 0x248   :  { %14 = sbr.rel (!%p12_p4) target bundleno = 1 (0x1), region = 70 }

// kernel: _mlp_forward_impl.1
= control target key start
LH: loop header
LB: loop body
LE: loop exit
PB: predicated region body
PF: predicated region fallthrough
CT: control target
= control target key end

     0   :  { %s1248_s18 = smov 0   ;;  %s1688_s0 = inlined_call_operand.vmem [shape: f32[512,64], index: 0, kind: input, shape index: {}]   ;;  %s1689_s1 = inlined_call_operand.vmem [shape: f32[64,256], index: 1, kind: input, shape index: {}]   ;;  %s1690_s2 = inlined_call_operand.vmem [shape: f32[1,256], index: 2, kind: input, shape index: {}]   ;;  %s1691_s3 = inlined_call_operand.vmem [shape: f32[256,128], index: 3, kind: input, shape index: {}]   ;;  %s1692_s4 = inlined_call_operand.vmem [shape: f32[1,128], index: 4, kind: input, shape index: {}]   ;;  %s1693_s5 = inlined_call_operand.vmem [shape: f32[512,128], index: 5, kind: output, shape index: {}]  }
   0x1 LB: > { %s1058_s19 = sadd.s32 4294967295, %s1214_s18   ;;  %p1062_p0 = scmp.ge.s32.totalorder %s1214_s18, 1  ;;  %s1214_s18 = sphi %s1248_s18, %s15_s18  }
   0x2   : > { %p188_p1 = scmp.lt.s32.totalorder %s1214_s18, 3 }
   0x4   : > { %p189_p2 = pnand %p1062_p0, %p188_p1 }
   0x5   : > { %v261_v0 = vld [vmem:[%s1689_s1 + $0x8] sm:$0xff] (!%p189_p2)  ;;  %v263_v1 = vld [vmem:[%s1689_s1 + $0x18] sm:$0xff] (!%p189_p2)  ;;  %v260_v2 = vld [vmem:[%s1689_s1] sm:$0xff] (!%p189_p2)  ;;  %s1063_s26 = sshll.u32 (!%p189_p2), %s1058_s19, 5  ;;  %v1216_v7 = vmov (!%p189_p2), 0.0   ;;  %vm288_vm0 = vcmask (!%p189_p2), 523264  }
   0x6   : > { %192 = sbr.rel (%p189_p2) target bundleno = 581 (0x245), region = 40  ;;  %v1102_v3 = vpack.c.bf16 (!%p189_p2), %v263_v1, %v261_v0  ;;  %v262_v4 = vld [vmem:[%s1689_s1 + $0x10] sm:$0xff] (!%p189_p2)  ;;  %v265_v5 = vld [vmem:[%s1689_s1 + $0x28] sm:$0xff] (!%p189_p2)  ;;  %v267_v6 = vld [vmem:[%s1689_s1 + $0x38] sm:$0xff] (!%p189_p2)  ;;  %449 = vmatprep.mubr.f32.mxu0 (!%p189_p2), %v1216_v7  ;;  %p217_p3 = scmp.lt.s32.totalorder (!%p189_p2), %s1063_s26, 63  ;;  %v1217_v26 = vmov (!%p189_p2), 0.0|0.0  }
   0x7   : > { %v1104_v8 = vpack.c.bf16 (!%p189_p2), %v262_v4, %v260_v2  ;;  %v1106_v9 = vpack.c.bf16 (!%p189_p2), %v267_v6, %v265_v5  ;;  %v264_v10 = vld [vmem:[%s1689_s1 + $0x20] sm:$0xff] (!%p189_p2)  ;;  %v266_v11 = vld [vmem:[%s1689_s1 + $0x30] sm:$0xff] (!%p189_p2)  ;;  %v269_v12 = vld [vmem:[%s1689_s1 + $0x48] sm:$0xff] (!%p189_p2)  ;;  %1166 = vmatprep.subr.bf16.mxu1 (!%p189_p2), %v1217_v26 }
   0x8   : > { %1103 = vmatprep.subr.bf16.mxu0 (!%p189_p2), %v1102_v3  ;;  %v271_v13 = vld [vmem:[%s1689_s1 + $0x58] sm:$0xff] (!%p189_p2)  ;;  %v1108_v14 = vpack.c.bf16 (!%p189_p2), %v266_v11, %v264_v10  ;;  %v268_v16 = vld [vmem:[%s1689_s1 + $0x40] sm:$0xff] (!%p189_p2)  ;;  %v270_v17 = vld [vmem:[%s1689_s1 + $0x50] sm:$0xff] (!%p189_p2) }
   0x9   : > { %1105 = vmatpush1.bf16.msra.mxu0 (!%p189_p2), %v1104_v8  ;;  %v1110_v15 = vpack.c.bf16 (!%p189_p2), %v271_v13, %v269_v12  ;;  %v273_v18 = vld [vmem:[%s1689_s1 + $0x68] sm:$0xff] (!%p189_p2)  ;;  %v275_v19 = vld [vmem:[%s1689_s1 + $0x78] sm:$0xff] (!%p189_p2)  ;;  %v1112_v20 = vpack.c.bf16 (!%p189_p2), %v270_v17, %v268_v16  ;;  %v272_v22 = vld [vmem:[%s1689_s1 + $0x60] sm:$0xff] (!%p189_p2) }
   0xa   : > { %1107 = vmatprep.subr.bf16.mxu0 (!%p189_p2), %v1106_v9  ;;  %v1114_v21 = vpack.c.bf16 (!%p189_p2), %v275_v19, %v273_v18  ;;  %v274_v23 = vld [vmem:[%s1689_s1 + $0x70] sm:$0xff] (!%p189_p2)  ;;  %v706_v27 = vld [vmem:[%s1691_s3] sm:$0xff] (!%p189_p2)  ;;  %v707_v28 = vld [vmem:[%s1691_s3 + $0x8] sm:$0xff] (!%p189_p2) }
   0xb   : > { %v1116_v24 = vpack.c.bf16 (!%p189_p2), %v274_v23, %v272_v22  ;;  %v708_v29 = vld [vmem:[%s1691_s3 + $0x10] sm:$0xff] (!%p189_p2)  ;;  %v709_v30 = vld [vmem:[%s1691_s3 + $0x18] sm:$0xff] (!%p189_p2)  ;;  %v1119_v31 = vpack.c.bf16 (!%p189_p2), %v707_v28, %v706_v27  ;;  %v710_v34 = vld [vmem:[%s1691_s3 + $0x20] sm:$0xff] (!%p189_p2) }
   0xc   : > { %v1122_v33 = vpack.c.bf16 (!%p189_p2), %v709_v30, %v708_v29  ;;  %v711_v35 = vld [vmem:[%s1691_s3 + $0x28] sm:$0xff] (!%p189_p2)  ;;  %v712_v38 = vld [vmem:[%s1691_s3 + $0x30] sm:$0xff] (!%p189_p2)  ;;  %v713_v39 = vld [vmem:[%s1691_s3 + $0x38] sm:$0xff] (!%p189_p2) }
   0xd   : > { %s1695_s26 = smov (!%p217_p3, %s1063_s26), 63  ;;  %1109 = vmatpush1.bf16.msra.mxu0 %v1108_v14  ;;  %1182 = vmatpush1.bf16.msra.mxu1 %v1119_v31  ;;  %v1125_v37 = vpack.c.bf16 %v711_v35, %v710_v34  ;;  %v1128_v41 = vpack.c.bf16 %v713_v39, %v712_v38  ;;  %v714_v42 = vld [vmem:[%s1691_s3 + $0x40] sm:$0xff]  ;;  %v715_v43 = vld [vmem:[%s1691_s3 + $0x48] sm:$0xff]  ;;  %v716_v46 = vld [vmem:[%s1691_s3 + $0x50] sm:$0xff] }
   0xe   : > { %1111 = vmatprep.subr.bf16.mxu0 %v1110_v15  ;;  %s1064_s30 = sshll.u32 %s1695_s26, 3  ;;  %1167 = vmatprep.subr.bf16.mxu1 %v1217_v26  ;;  %v1131_v45 = vpack.c.bf16 %v715_v43, %v714_v42  ;;  %v717_v47 = vld [vmem:[%s1691_s3 + $0x58] sm:$0xff]  ;;  %v718_v50 = vld [vmem:[%s1691_s3 + $0x60] sm:$0xff]  ;;  %v719_v51 = vld [vmem:[%s1691_s3 + $0x68] sm:$0xff]  ;;  %v278_v43 = vlaneseq }
   0xf   : > { %s1313_s8 = scalar_lea.vmem %s1688_s0, %s1064_s30  ;;  %v1134_v49 = vpack.c.bf16 %v717_v47, %v716_v46  ;;  %v1137_v53 = vpack.c.bf16 %v719_v51, %v718_v50  ;;  %v720_v54 = vld [vmem:[%s1691_s3 + $0x70] sm:$0xff]  ;;  %v721_v55 = vld [vmem:[%s1691_s3 + $0x78] sm:$0xff]  ;;  %v722_v58 = vld [vmem:[%s1691_s3 + $0x80] sm:$0xff]  ;;  %s1619_s15 = scalar_lea.vmem %s1693_s5, %s1064_s30 }
  0x10   : > { %v228_v25 = vld [vmem:[%s1313_s8] sm:$0xff]  ;;  %v229_v32 = vld [vmem:[%s1313_s8 + $0x8] sm:$0xff]  ;;  %v230_v36 = vld [vmem:[%s1313_s8 + $0x10] sm:$0xff]  ;;  %v1140_v57 = vpack.c.bf16 %v721_v55, %v720_v54 }
  0x11   : > { %1113 = vmatpush1.bf16.msra.mxu0 %v1112_v20  ;;  %1183 = vmatpush1.bf16.msra.mxu1 %v1122_v33  ;;  %v231_v40 = vld [vmem:[%s1313_s8 + $0x18] sm:$0xff]  ;;  %v232_v44 = vld [vmem:[%s1313_s8 + $0x20] sm:$0xff]  ;;  %v233_v48 = vld [vmem:[%s1313_s8 + $0x28] sm:$0xff] }
  0x12   : > { %1115 = vmatprep.subr.bf16.mxu0 %v1114_v21  ;;  %1168 = vmatprep.subr.bf16.mxu1 %v1217_v26  ;;  %v234_v52 = vld [vmem:[%s1313_s8 + $0x30] sm:$0xff]  ;;  %v235_v56 = vld [vmem:[%s1313_s8 + $0x38] sm:$0xff]  ;;  %v723_v59 = vld [vmem:[%s1691_s3 + $0x88] sm:$0xff] }
  0x13   : > { %v236_v60 = vld [vmem:[%s1313_s8 + $0x40] sm:$0xff]  ;;  %v1143_v61 = vpack.c.bf16 %v723_v59, %v722_v58  ;;  %v724_v62 = vld [vmem:[%s1691_s3 + $0x90] sm:$0xff]  ;;  %v725_v63 = vld [vmem:[%s1691_s3 + $0x98] sm:$0xff] }
  0x14   : > { %v237_v0 = vld [vmem:[%s1313_s8 + $0x48] sm:$0xff]  ;;  %v1146_v1 = vpack.c.bf16 %v725_v63, %v724_v62  ;;  %v726_v2 = vld [vmem:[%s1691_s3 + $0xa0] sm:$0xff]  ;;  %v238_v4 = vld [vmem:[%s1313_s8 + $0x50] sm:$0xff] }
  0x15   : > { %1117 = vmatpush1.bf16.msra.mxu0 %v1116_v24  ;;  %1184 = vmatpush1.bf16.msra.mxu1 %v1125_v37  ;;  %v727_v3 = vld [vmem:[%s1691_s3 + $0xa8] sm:$0xff]  ;;  %v728_v6 = vld [vmem:[%s1691_s3 + $0xb0] sm:$0xff]  ;;  %v729_v8 = vld [vmem:[%s1691_s3 + $0xb8] sm:$0xff] }
  0x16   : > { %1118 = vmatprep.subr.bf16.mxu0 %v1217_v26  ;;  %1169 = vmatprep.subr.bf16.mxu1 %v1217_v26  ;;  %v1149_v5 = vpack.c.bf16 %v727_v3, %v726_v2  ;;  %v239_v9 = vld [vmem:[%s1313_s8 + $0x58] sm:$0xff]  ;;  %v1152_v10 = vpack.c.bf16 %v729_v8, %v728_v6  ;;  %v730_v11 = vld [vmem:[%s1691_s3 + $0xc0] sm:$0xff]  ;;  %v731_v12 = vld [vmem:[%s1691_s3 + $0xc8] sm:$0xff] }
  0x17   : > { %v240_v13 = vld [vmem:[%s1313_s8 + $0x60] sm:$0xff]  ;;  %v1155_v14 = vpack.c.bf16 %v731_v12, %v730_v11  ;;  %v732_v15 = vld [vmem:[%s1691_s3 + $0xd0] sm:$0xff]  ;;  %v733_v16 = vld [vmem:[%s1691_s3 + $0xd8] sm:$0xff] }
  0x18   : > { %1067 = vmatmul.mubr.msk.f32.vlgmr.msra.gmra.mrb[0].mxu0 %vm288_vm0, %v228_v25  ;;  %v241_v17 = vld [vmem:[%s1313_s8 + $0x68] sm:$0xff]  ;;  %v1158_v18 = vpack.c.bf16 %v733_v16, %v732_v15  ;;  %v242_v19 = vld [vmem:[%s1313_s8 + $0x70] sm:$0xff]  ;;  %v243_v20 = vld [vmem:[%s1313_s8 + $0x78] sm:$0xff] }
  0x19   : > { %455 = vmatprep.mubr.f32.mxu0 %v1216_v7  ;;  %1120 = vmatpush1.bf16.msra.mxu0 %v1119_v31  ;;  %v244_v21 = vld [vmem:[%s1313_s8 + $0x80] sm:$0xff]  ;;  %v245_v22 = vld [vmem:[%s1313_s8 + $0x88] sm:$0xff]  ;;  %v246_v23 = vld [vmem:[%s1313_s8 + $0x90] sm:$0xff] }
  0x1a   : > { %1121 = vmatprep.subr.bf16.mxu0 %v1217_v26  ;;  %1185 = vmatpush1.bf16.msra.mxu1 %v1128_v41  ;;  %v247_v24 = vld [vmem:[%s1313_s8 + $0x98] sm:$0xff]  ;;  %v248_v25 = vld [vmem:[%s1313_s8 + $0xa0] sm:$0xff]  ;;  %v735_v28 = vld [vmem:[%s1691_s3 + $0xe8] sm:$0xff] }
  0x1b   : > { %1170 = vmatprep.subr.bf16.mxu1 %v1217_v26  ;;  %v734_v27 = vld [vmem:[%s1691_s3 + $0xe0] sm:$0xff]  ;;  %v249_v29 = vld [vmem:[%s1313_s8 + $0xa8] sm:$0xff]  ;;  %v736_v31 = vld [vmem:[%s1691_s3 + $0xf0] sm:$0xff] }
  0x1c   : > { %1068 = vmatmul.mubr.msk.f32.gmra.mrb[2].mxu0 %vm288_vm0, %v229_v32  ;;  %v1161_v30 = vpack.c.bf16 %v735_v28, %v734_v27  ;;  %v737_v32 = vld [vmem:[%s1691_s3 + $0xf8] sm:$0xff]  ;;  %v256_v39 = vld [vmem:[%s1313_s8 + $0xe0] sm:$0xff] }
  0x1d   : > { %461 = vmatprep.mubr.f32.mxu0 %v1216_v7  ;;  %1123 = vmatpush1.bf16.msra.mxu0 %v1122_v33  ;;  %v250_v33 = vld [vmem:[%s1313_s8 + $0xb0] sm:$0xff]  ;;  %v1164_v34 = vpack.c.bf16 %v737_v32, %v736_v31  ;;  %v251_v35 = vld [vmem:[%s1313_s8 + $0xb8] sm:$0xff]  ;;  %v276_v46 = vld [vmem:[%s1690_s2] sm:$0x3] }
  0x1e   : > { %1124 = vmatprep.subr.bf16.mxu0 %v1217_v26  ;;  %1186 = vmatpush1.bf16.msra.mxu1 %v1131_v45  ;;  %v255_v38 = vld [vmem:[%s1313_s8 + $0xd8] sm:$0xff] }
  0x1f   : > { %1171 = vmatprep.subr.bf16.mxu1 %v1217_v26  ;;  %v259_v42 = vld [vmem:[%s1313_s8 + $0xf8] sm:$0xff] }
  0x20   : > { %1069 = vmatmul.mubr.msk.f32.gmra.mrb[4].mxu0 %vm288_vm0, %v230_v36  ;;  %v252_v36 = vld [vmem:[%s1313_s8 + $0xc0] sm:$0xff] }
  0x21   : > { %467 = vmatprep.mubr.f32.mxu0 %v1216_v7  ;;  %1126 = vmatpush1.bf16.msra.mxu0 %v1125_v37  ;;  %v254_v37 = vld [vmem:[%s1313_s8 + $0xd0] sm:$0xff] }
  0x22   : > { %1127 = vmatprep.subr.bf16.mxu0 %v1217_v26  ;;  %1187 = vmatpush1.bf16.msra.mxu1 %v1134_v49 }
  0x23   : > { %1172 = vmatprep.subr.bf16.mxu1 %v1217_v26 }
  0x24   : > { %1070 = vmatmul.mubr.msk.f32.gmra.mrb[6].mxu0 %vm288_vm0, %v231_v40  ;;  %v257_v40 = vld [vmem:[%s1313_s8 + $0xe8] sm:$0xff] }
  0x25   : > { %473 = vmatprep.mubr.f32.mxu0 %v1216_v7  ;;  %1129 = vmatpush1.bf16.msra.mxu0 %v1128_v41  ;;  %v258_v41 = vld [vmem:[%s1313_s8 + $0xf0] sm:$0xff] }
  0x26   : > { %1130 = vmatprep.subr.bf16.mxu0 %v1217_v26  ;;  %1188 = vmatpush1.bf16.msra.mxu1 %v1137_v53 }
  0x27   : > { %1173 = vmatprep.subr.bf16.mxu1 %v1217_v26 }
  0x28   : > { %1071 = vmatmul.mubr.msk.f32.gmra.mrb[8].mxu0 %vm288_vm0, %v232_v44  ;;  %v279_v44 = vshrl.u32 %v278_v43, 7 }
  0x29   : > { %479 = vmatprep.mubr.f32.mxu0 %v1216_v7  ;;  %1132 = vmatpush1.bf16.msra.mxu0 %v1131_v45 }
  0x2a   : > { %1133 = vmatprep.subr.bf16.mxu0 %v1217_v26  ;;  %1189 = vmatpush1.bf16.msra.mxu1 %v1140_v57  ;;  %v280_v45 = vsub.s32 0, %v279_v44  ;;  %v284_v47 = vsub.s32 1, %v279_v44 }
  0x2b   : > { %1174 = vmatprep.subr.bf16.mxu1 %v1217_v26 }
  0x2c   : > { %1072 = vmatmul.mubr.msk.f32.gmra.mrb[10].mxu0 %vm288_vm0, %v233_v48  ;;  %v1541_v48 = vrot.slane %v276_v46, %v280_v45 }
  0x2d   : > { %485 = vmatprep.mubr.f32.mxu0 %v1216_v7  ;;  %1135 = vmatpush1.bf16.msra.mxu0 %v1134_v49  ;;  %v1543_v49 = vrot.slane %v276_v46, %v284_v47 }
  0x2e   : > { %1136 = vmatprep.subr.bf16.mxu0 %v1217_v26  ;;  %1190 = vmatpush1.bf16.msra.mxu1 %v1143_v61 }
  0x2f   : > { %1175 = vmatprep.subr.bf16.mxu1 %v1217_v26 }
  0x30   : > { %1073 = vmatmul.mubr.msk.f32.gmra.mrb[12].mxu0 %vm288_vm0, %v234_v52 }
  0x31   : > { %491 = vmatprep.mubr.f32.mxu0 %v1216_v7  ;;  %1138 = vmatpush1.bf16.msra.mxu0 %v1137_v53 }
  0x32   : > { %1139 = vmatprep.subr.bf16.mxu0 %v1217_v26  ;;  %1191 = vmatpush1.bf16.msra.mxu1 %v1146_v1 }
  0x33   : > { %1176 = vmatprep.subr.bf16.mxu1 %v1217_v26 }
  0x34   : > { %1074 = vmatmul.mubr.msk.f32.gmra.mrb[14].mxu0 %vm288_vm0, %v235_v56 }
  0x35   : > { %497 = vmatprep.mubr.f32.mxu0 %v1216_v7  ;;  %1141 = vmatpush1.bf16.msra.mxu0 %v1140_v57 }
  0x36   : > { %1142 = vmatprep.subr.bf16.mxu0 %v1217_v26  ;;  %1192 = vmatpush1.bf16.msra.mxu1 %v1149_v5 }
  0x37   : > { %1177 = vmatprep.subr.bf16.mxu1 %v1217_v26 }
  0x38   : > { %1075 = vmatmul.mubr.msk.f32.gmra.mrb[16].mxu0 %vm288_vm0, %v236_v60 }
  0x39   : > { %503 = vmatprep.mubr.f32.mxu0 %v1216_v7  ;;  %1144 = vmatpush1.bf16.msra.mxu0 %v1143_v61 }
  0x3a   : > { %1145 = vmatprep.subr.bf16.mxu0 %v1217_v26  ;;  %1193 = vmatpush1.bf16.msra.mxu1 %v1152_v10 }
  0x3b   : > { %1178 = vmatprep.subr.bf16.mxu1 %v1217_v26 }
  0x3c   : > { %1076 = vmatmul.mubr.msk.f32.gmra.mrb[18].mxu0 %vm288_vm0, %v237_v0 }
  0x3d   : > { %509 = vmatprep.mubr.f32.mxu0 %v1216_v7  ;;  %1147 = vmatpush1.bf16.msra.mxu0 %v1146_v1 }
  0x3e   : > { %1148 = vmatprep.subr.bf16.mxu0 %v1217_v26  ;;  %1194 = vmatpush1.bf16.msra.mxu1 %v1155_v14 }
  0x3f   : > { %1179 = vmatprep.subr.bf16.mxu1 %v1217_v26 }
  0x40   : > { %1077 = vmatmul.mubr.msk.f32.gmra.mrb[20].mxu0 %vm288_vm0, %v238_v4 }
  0x41   : > { %515 = vmatprep.mubr.f32.mxu0 %v1216_v7  ;;  %1150 = vmatpush1.bf16.msra.mxu0 %v1149_v5 }
  0x42   : > { %1151 = vmatprep.subr.bf16.mxu0 %v1217_v26  ;;  %1195 = vmatpush1.bf16.msra.mxu1 %v1158_v18 }
  0x43   : > { %1180 = vmatprep.subr.bf16.mxu1 %v1217_v26 }
  0x44   : > { %1078 = vmatmul.mubr.msk.f32.gmra.mrb[22].mxu0 %vm288_vm0, %v239_v9 }
  0x45   : > { %521 = vmatprep.mubr.f32.mxu0 %v1216_v7  ;;  %1153 = vmatpush1.bf16.msra.mxu0 %v1152_v10 }
  0x46   : > { %1154 = vmatprep.subr.bf16.mxu0 %v1217_v26  ;;  %1196 = vmatpush1.bf16.msra.mxu1 %v1161_v30 }
  0x47   : > { %1181 = vmatprep.subr.bf16.mxu1 %v1217_v26 }
  0x48   : > { %1079 = vmatmul.mubr.msk.f32.gmra.mrb[24].mxu0 %vm288_vm0, %v240_v13 }
  0x49   : > { %527 = vmatprep.mubr.f32.mxu0 %v1216_v7  ;;  %1156 = vmatpush1.bf16.msra.mxu0 %v1155_v14 }
  0x4a   : > { %1157 = vmatprep.subr.bf16.mxu0 %v1217_v26  ;;  %1197 = vmatpush1.bf16.msra.mxu1 %v1164_v34 }
  0x4c   : > { %1080 = vmatmul.mubr.msk.f32.gmra.mrb[26].mxu0 %vm288_vm0, %v241_v17 }
  0x4d   : > { %533 = vmatprep.mubr.f32.mxu0 %v1216_v7  ;;  %1159 = vmatpush1.bf16.msra.mxu0 %v1158_v18 }
  0x4e   : > { %1160 = vmatprep.subr.bf16.mxu0 %v1217_v26 }
  0x50   : > { %1081 = vmatmul.mubr.msk.f32.gmra.mrb[28].mxu0 %vm288_vm0, %v242_v19 }
  0x51   : > { %539 = vmatprep.mubr.f32.mxu0 %v1216_v7  ;;  %1162 = vmatpush1.bf16.msra.mxu0 %v1161_v30 }
  0x52   : > { %1163 = vmatprep.subr.bf16.mxu0 %v1217_v26  ;;  %v253_v26 = vld [vmem:[%s1313_s8 + $0xc8] sm:$0xff] }
  0x54   : > { %1082 = vmatmul.mubr.msk.f32.gmra.mrb[30].mxu0 %vm288_vm0, %v243_v20 }
  0x55   : > { %545 = vmatprep.mubr.f32.mxu0 %v1216_v7  ;;  %1165 = vmatpush1.bf16.msra.mxu0 %v1164_v34 }
  0x58   : > { %1083 = vmatmul.mubr.msk.f32.gmra.mrb[32].mxu0 %vm288_vm0, %v244_v21 }
  0x59   : > { %551 = vmatprep.mubr.f32.mxu0 %v1216_v7 }
  0x5c   : > { %1084 = vmatmul.mubr.msk.f32.gmra.mrb[34].mxu0 %vm288_vm0, %v245_v22 }
  0x5d   : > { %557 = vmatprep.mubr.f32.mxu0 %v1216_v7 }
  0x60   : > { %1085 = vmatmul.mubr.msk.f32.gmra.mrb[36].mxu0 %vm288_vm0, %v246_v23 }
  0x61   : > { %563 = vmatprep.mubr.f32.mxu0 %v1216_v7 }
  0x64   : > { %1086 = vmatmul.mubr.msk.f32.gmra.mrb[38].mxu0 %vm288_vm0, %v247_v24 }
  0x65   : > { %569 = vmatprep.mubr.f32.mxu0 %v1216_v7 }
  0x68   : > { %1087 = vmatmul.mubr.msk.f32.gmra.mrb[40].mxu0 %vm288_vm0, %v248_v25 }
  0x69   : > { %575 = vmatprep.mubr.f32.mxu0 %v1216_v7 }
  0x6c   : > { %1088 = vmatmul.mubr.msk.f32.gmra.mrb[42].mxu0 %vm288_vm0, %v249_v29 }
  0x6d   : > { %581 = vmatprep.mubr.f32.mxu0 %v1216_v7 }
  0x70   : > { %1089 = vmatmul.mubr.msk.f32.gmra.mrb[44].mxu0 %vm288_vm0, %v250_v33 }
  0x71   : > { %587 = vmatprep.mubr.f32.mxu0 %v1216_v7 }
  0x74   : > { %1090 = vmatmul.mubr.msk.f32.gmra.mrb[46].mxu0 %vm288_vm0, %v251_v35 }
  0x75   : > { %593 = vmatprep.mubr.f32.mxu0 %v1216_v7 }
  0x78   : > { %1091 = vmatmul.mubr.msk.f32.gmra.mrb[48].mxu0 %vm288_vm0, %v252_v36 }
  0x79   : > { %599 = vmatprep.mubr.f32.mxu0 %v1216_v7 }
  0x7c   : > { %1092 = vmatmul.mubr.msk.f32.gmra.mrb[50].mxu0 %vm288_vm0, %v253_v26 }
  0x7d   : > { %605 = vmatprep.mubr.f32.mxu0 %v1216_v7 }
  0x80   : > { %1093 = vmatmul.mubr.msk.f32.gmra.mrb[52].mxu0 %vm288_vm0, %v254_v37 }
  0x81   : > { %611 = vmatprep.mubr.f32.mxu0 %v1216_v7 }
  0x84   : > { %1094 = vmatmul.mubr.msk.f32.gmra.mrb[54].mxu0 %vm288_vm0, %v255_v38 }
  0x85   : > { %617 = vmatprep.mubr.f32.mxu0 %v1216_v7 }
  0x88   : > { %1095 = vmatmul.mubr.msk.f32.gmra.mrb[56].mxu0 %vm288_vm0, %v256_v39 }
  0x89   : > { %623 = vmatprep.mubr.f32.mxu0 %v1216_v7 }
  0x8c   : > { %1096 = vmatmul.mubr.msk.f32.gmra.mrb[58].mxu0 %vm288_vm0, %v257_v40 }
  0x8d   : > { %629 = vmatprep.mubr.f32.mxu0 %v1216_v7 }
  0x90   : > { %1097 = vmatmul.mubr.msk.f32.gmra.mrb[60].mxu0 %vm288_vm0, %v258_v41 }
  0x91   : > { %635 = vmatprep.mubr.f32.mxu0 %v1216_v7 }
  0x94   : > { %1098 = vmatmul.mubr.msk.f32.gmra.mrb[62].mxu0 %vm288_vm0, %v259_v42 }
  0xeb   : > { %v451_v50 = vpop.f32.mrb[0].mxu0 }
  0xec   : > { %v452_v51 = vadd.f32 %v451_v50, %v1541_v48  ;;  %v453_v52 = vpop.f32.mrb[1].mxu0 }
  0xed   : > { %v454_v7 = vadd.f32 %v453_v52, %v1543_v49 }
  0xee   : > { %v642_v55 = vmax.f32 %v452_v51, 0.0 }
  0xef   : > { %v643_v53 = vmax.f32 %v454_v7, 0.0  ;;  %v457_v54 = vpop.f32.mrb[2].mxu0 }
  0xf0   : > { %v458_v56 = vadd.f32 %v457_v54, %v1541_v48  ;;  %v459_v57 = vpop.f32.mrb[3].mxu0 }
  0xf1   : > { %v460_v58 = vadd.f32 %v459_v57, %v1543_v49  ;;  %809 = vmatprep.mubr.f32.mxu0 %v643_v53 }
  0xf2   : > { %810 = vmatmul.mubr.f32.vlgmr.msra.gmra.mrb[64].mxu0 %v642_v55  ;;  %v644_v61 = vmax.f32 %v458_v56, 0.0 }
  0xf3   : > { %v645_v59 = vmax.f32 %v460_v58, 0.0  ;;  %v463_v60 = vpop.f32.mrb[4].mxu0 }
  0xf4   : > { %v464_v62 = vadd.f32 %v463_v60, %v1541_v48  ;;  %v465_v63 = vpop.f32.mrb[5].mxu0 }
  0xf5   : > { %v466_v0 = vadd.f32 %v465_v63, %v1543_v49  ;;  %814 = vmatprep.mubr.f32.mxu0 %v645_v59 }
  0xf6   : > { %815 = vmatmul.mubr.f32.gmra.mrb[66].mxu0 %v644_v61  ;;  %v646_v3 = vmax.f32 %v464_v62, 0.0 }
  0xf7   : > { %v647_v1 = vmax.f32 %v466_v0, 0.0  ;;  %v469_v2 = vpop.f32.mrb[6].mxu0 }
  0xf8   : > { %v470_v4 = vadd.f32 %v469_v2, %v1541_v48  ;;  %v471_v5 = vpop.f32.mrb[7].mxu0 }
  0xf9   : > { %v472_v6 = vadd.f32 %v471_v5, %v1543_v49  ;;  %819 = vmatprep.mubr.f32.mxu0 %v647_v1 }
  0xfa   : > { %820 = vmatmul.mubr.f32.gmra.mrb[68].mxu0 %v646_v3  ;;  %v648_v10 = vmax.f32 %v470_v4, 0.0 }
  0xfb   : > { %v649_v8 = vmax.f32 %v472_v6, 0.0  ;;  %v475_v9 = vpop.f32.mrb[8].mxu0 }
  0xfc   : > { %v476_v11 = vadd.f32 %v475_v9, %v1541_v48  ;;  %v477_v12 = vpop.f32.mrb[9].mxu0 }
  0xfd   : > { %v478_v13 = vadd.f32 %v477_v12, %v1543_v49  ;;  %824 = vmatprep.mubr.f32.mxu0 %v649_v8 }
  0xfe   : > { %825 = vmatmul.mubr.f32.gmra.mrb[70].mxu0 %v648_v10  ;;  %v650_v16 = vmax.f32 %v476_v11, 0.0 }
  0xff   : > { %v651_v14 = vmax.f32 %v478_v13, 0.0  ;;  %v481_v15 = vpop.f32.mrb[10].mxu0 }
 0x100   : > { %v482_v17 = vadd.f32 %v481_v15, %v1541_v48  ;;  %v483_v18 = vpop.f32.mrb[11].mxu0 }
 0x101   : > { %v484_v19 = vadd.f32 %v483_v18, %v1543_v49  ;;  %829 = vmatprep.mubr.f32.mxu0 %v651_v14 }
 0x102   : > { %830 = vmatmul.mubr.f32.gmra.mrb[72].mxu0 %v650_v16  ;;  %v652_v22 = vmax.f32 %v482_v17, 0.0 }
 0x103   : > { %v653_v20 = vmax.f32 %v484_v19, 0.0  ;;  %v487_v21 = vpop.f32.mrb[12].mxu0 }
 0x104   : > { %v488_v23 = vadd.f32 %v487_v21, %v1541_v48  ;;  %v489_v24 = vpop.f32.mrb[13].mxu0 }
 0x105   : > { %834 = vmatprep.mubr.f32.mxu0 %v653_v20  ;;  %v490_v25 = vadd.f32 %v489_v24, %v1543_v49 }
 0x106   : > { %835 = vmatmul.mubr.f32.gmra.mrb[74].mxu0 %v652_v22  ;;  %v654_v29 = vmax.f32 %v488_v23, 0.0 }
 0x107   : > { %v493_v27 = vpop.f32.mrb[14].mxu0  ;;  %v655_v28 = vmax.f32 %v490_v25, 0.0 }
 0x108   : > { %v494_v30 = vadd.f32 %v493_v27, %v1541_v48  ;;  %v495_v31 = vpop.f32.mrb[15].mxu0 }
 0x109   : > { %v496_v32 = vadd.f32 %v495_v31, %v1543_v49  ;;  %839 = vmatprep.mubr.f32.mxu1 %v655_v28 }
 0x10a   : > { %840 = vmatmul.mubr.f32.vlgmr.msra.gmra.mrb[0].mxu1 %v654_v29  ;;  %v656_v35 = vmax.f32 %v494_v30, 0.0 }
 0x10b   : > { %v657_v33 = vmax.f32 %v496_v32, 0.0  ;;  %v499_v34 = vpop.f32.mrb[16].mxu0 }
 0x10c   : > { %v500_v36 = vadd.f32 %v499_v34, %v1541_v48  ;;  %v501_v26 = vpop.f32.mrb[17].mxu0 }
 0x10d   : > { %v502_v37 = vadd.f32 %v501_v26, %v1543_v49  ;;  %844 = vmatprep.mubr.f32.mxu1 %v657_v33 }
 0x10e   : > { %845 = vmatmul.mubr.f32.gmra.mrb[2].mxu1 %v656_v35  ;;  %v658_v40 = vmax.f32 %v500_v36, 0.0 }
 0x10f   : > { %v659_v38 = vmax.f32 %v502_v37, 0.0  ;;  %v505_v39 = vpop.f32.mrb[18].mxu0 }
 0x110   : > { %v506_v41 = vadd.f32 %v505_v39, %v1541_v48  ;;  %v507_v42 = vpop.f32.mrb[19].mxu0 }
 0x111   : > { %v508_v43 = vadd.f32 %v507_v42, %v1543_v49  ;;  %849 = vmatprep.mubr.f32.mxu1 %v659_v38 }
 0x112   : > { %850 = vmatmul.mubr.f32.gmra.mrb[4].mxu1 %v658_v40  ;;  %v660_v46 = vmax.f32 %v506_v41, 0.0 }
 0x113   : > { %v661_v44 = vmax.f32 %v508_v43, 0.0  ;;  %v511_v45 = vpop.f32.mrb[20].mxu0 }
 0x114   : > { %v512_v47 = vadd.f32 %v511_v45, %v1541_v48  ;;  %v513_v50 = vpop.f32.mrb[21].mxu0 }
 0x115   : > { %v514_v51 = vadd.f32 %v513_v50, %v1543_v49  ;;  %854 = vmatprep.mubr.f32.mxu1 %v661_v44 }
 0x116   : > { %855 = vmatmul.mubr.f32.gmra.mrb[6].mxu1 %v660_v46  ;;  %v662_v53 = vmax.f32 %v512_v47, 0.0 }
 0x117   : > { %v663_v52 = vmax.f32 %v514_v51, 0.0  ;;  %v517_v7 = vpop.f32.mrb[22].mxu0 }
 0x118   : > { %v518_v54 = vadd.f32 %v517_v7, %v1541_v48  ;;  %v519_v55 = vpop.f32.mrb[23].mxu0 }
 0x119   : > { %v520_v56 = vadd.f32 %v519_v55, %v1543_v49  ;;  %859 = vmatprep.mubr.f32.mxu1 %v663_v52 }
 0x11a   : > { %860 = vmatmul.mubr.f32.gmra.mrb[8].mxu1 %v662_v53  ;;  %v664_v59 = vmax.f32 %v518_v54, 0.0 }
 0x11b   : > { %v665_v57 = vmax.f32 %v520_v56, 0.0  ;;  %v523_v58 = vpop.f32.mrb[24].mxu0 }
 0x11c   : > { %v524_v60 = vadd.f32 %v523_v58, %v1541_v48  ;;  %v525_v61 = vpop.f32.mrb[25].mxu0 }
 0x11d   : > { %v526_v62 = vadd.f32 %v525_v61, %v1543_v49  ;;  %864 = vmatprep.mubr.f32.mxu1 %v665_v57 }
 0x11e   : > { %865 = vmatmul.mubr.f32.gmra.mrb[10].mxu1 %v664_v59  ;;  %v666_v1 = vmax.f32 %v524_v60, 0.0 }
 0x11f   : > { %v667_v63 = vmax.f32 %v526_v62, 0.0  ;;  %v529_v0 = vpop.f32.mrb[26].mxu0 }
 0x120   : > { %v530_v2 = vadd.f32 %v529_v0, %v1541_v48  ;;  %v531_v3 = vpop.f32.mrb[27].mxu0 }
 0x121   : > { %v532_v4 = vadd.f32 %v531_v3, %v1543_v49  ;;  %869 = vmatprep.mubr.f32.mxu1 %v667_v63 }
 0x122   : > { %870 = vmatmul.mubr.f32.gmra.mrb[12].mxu1 %v666_v1  ;;  %v668_v8 = vmax.f32 %v530_v2, 0.0 }
 0x123   : > { %v669_v5 = vmax.f32 %v532_v4, 0.0  ;;  %v535_v6 = vpop.f32.mrb[28].mxu0 }
 0x124   : > { %v536_v9 = vadd.f32 %v535_v6, %v1541_v48  ;;  %v537_v10 = vpop.f32.mrb[29].mxu0 }
 0x125   : > { %v538_v11 = vadd.f32 %v537_v10, %v1543_v49  ;;  %874 = vmatprep.mubr.f32.mxu1 %v669_v5 }
 0x126   : > { %875 = vmatmul.mubr.f32.gmra.mrb[14].mxu1 %v668_v8  ;;  %v670_v14 = vmax.f32 %v536_v9, 0.0 }
 0x127   : > { %v671_v12 = vmax.f32 %v538_v11, 0.0  ;;  %v541_v13 = vpop.f32.mrb[30].mxu0 }
 0x128   : > { %v542_v15 = vadd.f32 %v541_v13, %v1541_v48  ;;  %v543_v16 = vpop.f32.mrb[31].mxu0 }
 0x129   : > { %v544_v17 = vadd.f32 %v543_v16, %v1543_v49  ;;  %879 = vmatprep.mubr.f32.mxu1 %v671_v12 }
 0x12a   : > { %880 = vmatmul.mubr.f32.gmra.mrb[16].mxu1 %v670_v14  ;;  %v672_v20 = vmax.f32 %v542_v15, 0.0 }
 0x12b   : > { %v673_v18 = vmax.f32 %v544_v17, 0.0  ;;  %v547_v19 = vpop.f32.mrb[32].mxu0 }
 0x12c   : > { %v548_v21 = vadd.f32 %v547_v19, %v1541_v48  ;;  %v549_v22 = vpop.f32.mrb[33].mxu0 }
 0x12d   : > { %v550_v23 = vadd.f32 %v549_v22, %v1543_v49  ;;  %884 = vmatprep.mubr.f32.mxu1 %v673_v18 }
 0x12e   : > { %885 = vmatmul.mubr.f32.gmra.mrb[18].mxu1 %v672_v20  ;;  %v674_v27 = vmax.f32 %v548_v21, 0.0 }
 0x12f   : > { %v675_v24 = vmax.f32 %v550_v23, 0.0  ;;  %v553_v25 = vpop.f32.mrb[34].mxu0 }
 0x130   : > { %v554_v28 = vadd.f32 %v553_v25, %v1541_v48  ;;  %v555_v29 = vpop.f32.mrb[35].mxu0 }
 0x131   : > { %v556_v30 = vadd.f32 %v555_v29, %v1543_v49  ;;  %889 = vmatprep.mubr.f32.mxu1 %v675_v24 }
 0x132   : > { %890 = vmatmul.mubr.f32.gmra.mrb[20].mxu1 %v674_v27  ;;  %v676_v33 = vmax.f32 %v554_v28, 0.0 }
 0x133   : > { %v677_v31 = vmax.f32 %v556_v30, 0.0  ;;  %v559_v32 = vpop.f32.mrb[36].mxu0 }
 0x134   : > { %v560_v34 = vadd.f32 %v559_v32, %v1541_v48  ;;  %v561_v35 = vpop.f32.mrb[37].mxu0 }
 0x135   : > { %v562_v36 = vadd.f32 %v561_v35, %v1543_v49  ;;  %894 = vmatprep.mubr.f32.mxu1 %v677_v31 }
 0x136   : > { %895 = vmatmul.mubr.f32.gmra.mrb[22].mxu1 %v676_v33  ;;  %v678_v38 = vmax.f32 %v560_v34, 0.0 }
 0x137   : > { %v679_v26 = vmax.f32 %v562_v36, 0.0  ;;  %v565_v37 = vpop.f32.mrb[38].mxu0 }
 0x138   : > { %v566_v39 = vadd.f32 %v565_v37, %v1541_v48  ;;  %v567_v40 = vpop.f32.mrb[39].mxu0 }
 0x139   : > { %v568_v41 = vadd.f32 %v567_v40, %v1543_v49  ;;  %899 = vmatprep.mubr.f32.mxu1 %v679_v26 }
 0x13a   : > { %900 = vmatmul.mubr.f32.gmra.mrb[24].mxu1 %v678_v38  ;;  %v680_v44 = vmax.f32 %v566_v39, 0.0 }
 0x13b   : > { %v681_v42 = vmax.f32 %v568_v41, 0.0  ;;  %v571_v43 = vpop.f32.mrb[40].mxu0 }
 0x13c   : > { %v572_v45 = vadd.f32 %v571_v43, %v1541_v48  ;;  %v573_v46 = vpop.f32.mrb[41].mxu0 }
 0x13d   : > { %v574_v47 = vadd.f32 %v573_v46, %v1543_v49  ;;  %904 = vmatprep.mubr.f32.mxu1 %v681_v42 }
 0x13e   : > { %905 = vmatmul.mubr.f32.gmra.mrb[26].mxu1 %v680_v44  ;;  %v682_v52 = vmax.f32 %v572_v45, 0.0 }
 0x13f   : > { %v683_v50 = vmax.f32 %v574_v47, 0.0  ;;  %v577_v51 = vpop.f32.mrb[42].mxu0 }
 0x140   : > { %v578_v7 = vadd.f32 %v577_v51, %v1541_v48  ;;  %v579_v53 = vpop.f32.mrb[43].mxu0 }
 0x141   : > { %v580_v54 = vadd.f32 %v579_v53, %v1543_v49  ;;  %909 = vmatprep.mubr.f32.mxu1 %v683_v50 }
 0x142   : > { %910 = vmatmul.mubr.f32.gmra.mrb[28].mxu1 %v682_v52  ;;  %v684_v57 = vmax.f32 %v578_v7, 0.0 }
 0x143   : > { %v685_v55 = vmax.f32 %v580_v54, 0.0  ;;  %v583_v56 = vpop.f32.mrb[44].mxu0 }
 0x144   : > { %v584_v58 = vadd.f32 %v583_v56, %v1541_v48  ;;  %v585_v59 = vpop.f32.mrb[45].mxu0 }
 0x145   : > { %v586_v60 = vadd.f32 %v585_v59, %v1543_v49  ;;  %914 = vmatprep.mubr.f32.mxu1 %v685_v55  ;;  %v1612_v55 = vld [vmem:[%s1692_s4] ss:$0 sm:$0xff] }
 0x146   : > { %915 = vmatmul.mubr.f32.gmra.mrb[30].mxu1 %v684_v57  ;;  %v686_v63 = vmax.f32 %v584_v58, 0.0 }
 0x147   : > { %v687_v61 = vmax.f32 %v586_v60, 0.0  ;;  %v589_v62 = vpop.f32.mrb[46].mxu0 }
 0x148   : > { %v590_v0 = vadd.f32 %v589_v62, %v1541_v48  ;;  %v591_v1 = vpop.f32.mrb[47].mxu0 }
 0x149   : > { %v592_v2 = vadd.f32 %v591_v1, %v1543_v49  ;;  %919 = vmatprep.mubr.f32.mxu1 %v687_v61 }
 0x14a   : > { %920 = vmatmul.mubr.f32.gmra.mrb[32].mxu1 %v686_v63  ;;  %v688_v5 = vmax.f32 %v590_v0, 0.0 }
 0x14b   : > { %v689_v3 = vmax.f32 %v592_v2, 0.0  ;;  %v595_v4 = vpop.f32.mrb[48].mxu0 }
 0x14c   : > { %v596_v6 = vadd.f32 %v595_v4, %v1541_v48  ;;  %v597_v8 = vpop.f32.mrb[49].mxu0 }
 0x14d   : > { %v598_v9 = vadd.f32 %v597_v8, %v1543_v49  ;;  %924 = vmatprep.mubr.f32.mxu1 %v689_v3 }
 0x14e   : > { %925 = vmatmul.mubr.f32.gmra.mrb[34].mxu1 %v688_v5  ;;  %v690_v12 = vmax.f32 %v596_v6, 0.0 }
 0x14f   : > { %v691_v10 = vmax.f32 %v598_v9, 0.0  ;;  %v601_v11 = vpop.f32.mrb[50].mxu0 }
 0x150   : > { %v602_v13 = vadd.f32 %v601_v11, %v1541_v48  ;;  %v603_v14 = vpop.f32.mrb[51].mxu0 }
 0x151   : > { %v604_v15 = vadd.f32 %v603_v14, %v1543_v49  ;;  %929 = vmatprep.mubr.f32.mxu1 %v691_v10 }
 0x152   : > { %930 = vmatmul.mubr.f32.gmra.mrb[36].mxu1 %v690_v12  ;;  %v692_v18 = vmax.f32 %v602_v13, 0.0 }
 0x153   : > { %v693_v16 = vmax.f32 %v604_v15, 0.0  ;;  %v607_v17 = vpop.f32.mrb[52].mxu0 }
 0x154   : > { %v608_v19 = vadd.f32 %v607_v17, %v1541_v48  ;;  %v609_v20 = vpop.f32.mrb[53].mxu0 }
 0x155   : > { %v610_v21 = vadd.f32 %v609_v20, %v1543_v49  ;;  %934 = vmatprep.mubr.f32.mxu1 %v693_v16 }
 0x156   : > { %935 = vmatmul.mubr.f32.gmra.mrb[38].mxu1 %v692_v18  ;;  %v694_v24 = vmax.f32 %v608_v19, 0.0 }
 0x157   : > { %v695_v22 = vmax.f32 %v610_v21, 0.0  ;;  %v613_v23 = vpop.f32.mrb[54].mxu0 }
 0x158   : > { %v614_v25 = vadd.f32 %v613_v23, %v1541_v48  ;;  %v615_v27 = vpop.f32.mrb[55].mxu0 }
 0x159   : > { %v616_v28 = vadd.f32 %v615_v27, %v1543_v49  ;;  %939 = vmatprep.mubr.f32.mxu1 %v695_v22 }
 0x15a   : > { %940 = vmatmul.mubr.f32.gmra.mrb[40].mxu1 %v694_v24  ;;  %v696_v31 = vmax.f32 %v614_v25, 0.0 }
 0x15b   : > { %v697_v29 = vmax.f32 %v616_v28, 0.0  ;;  %v619_v30 = vpop.f32.mrb[56].mxu0 }
 0x15c   : > { %v620_v32 = vadd.f32 %v619_v30, %v1541_v48  ;;  %v621_v33 = vpop.f32.mrb[57].mxu0 }
 0x15d   : > { %v622_v34 = vadd.f32 %v621_v33, %v1543_v49  ;;  %944 = vmatprep.mubr.f32.mxu1 %v697_v29 }
 0x15e   : > { %945 = vmatmul.mubr.f32.gmra.mrb[42].mxu1 %v696_v31  ;;  %v698_v26 = vmax.f32 %v620_v32, 0.0 }
 0x15f   : > { %v699_v35 = vmax.f32 %v622_v34, 0.0  ;;  %v625_v36 = vpop.f32.mrb[58].mxu0 }
 0x160   : > { %v626_v37 = vadd.f32 %v625_v36, %v1541_v48  ;;  %v627_v38 = vpop.f32.mrb[59].mxu0 }
 0x161   : > { %v628_v39 = vadd.f32 %v627_v38, %v1543_v49  ;;  %949 = vmatprep.mubr.f32.mxu1 %v699_v35 }
 0x162   : > { %950 = vmatmul.mubr.f32.gmra.mrb[44].mxu1 %v698_v26  ;;  %v700_v42 = vmax.f32 %v626_v37, 0.0 }
 0x163   : > { %v701_v40 = vmax.f32 %v628_v39, 0.0  ;;  %v631_v41 = vpop.f32.mrb[60].mxu0 }
 0x164   : > { %v632_v43 = vadd.f32 %v631_v41, %v1541_v48  ;;  %v633_v44 = vpop.f32.mrb[61].mxu0 }
 0x165   : > { %v634_v45 = vadd.f32 %v633_v44, %v1543_v49  ;;  %954 = vmatprep.mubr.f32.mxu1 %v701_v40 }
 0x166   : > { %955 = vmatmul.mubr.f32.gmra.mrb[46].mxu1 %v700_v42  ;;  %v702_v50 = vmax.f32 %v632_v43, 0.0 }
 0x167   : > { %v703_v46 = vmax.f32 %v634_v45, 0.0  ;;  %v637_v47 = vpop.f32.mrb[62].mxu0 }
 0x168   : > { %v638_v51 = vadd.f32 %v637_v47, %v1541_v48  ;;  %v639_v52 = vpop.f32.mrb[63].mxu0 }
 0x169   : > { %v640_v7 = vadd.f32 %v639_v52, %v1543_v49  ;;  %959 = vmatprep.mubr.f32.mxu1 %v703_v46 }
 0x16a   : > { %960 = vmatmul.mubr.f32.gmra.mrb[48].mxu1 %v702_v50  ;;  %v704_v54 = vmax.f32 %v638_v51, 0.0 }
 0x16b   : > { %v705_v53 = vmax.f32 %v640_v7, 0.0 }
 0x16d   : > { %964 = vmatprep.mubr.f32.mxu1 %v705_v53 }
 0x16e   : > { %965 = vmatmul.mubr.f32.gmra.mrb[50].mxu1 %v704_v54 }
 0x1c5   : > { %v811_v48 = vpop.f32.mrb[64].mxu0 }
 0x1c6   : > { %v812_v49 = vadd.f32 %v1612_v55, %v811_v48  ;;  %v813_v56 = vpop.f32.mrb[65].mxu0 }
 0x1c8   : > { %970 = vst [vmem:[%s1619_s15] sm:$0xff] %v812_v49 }
 0x1c9   : > { %v816_v57 = vpop.f32.mrb[66].mxu0 }
 0x1ca   : > { %v817_v58 = vadd.f32 %v1612_v55, %v816_v57  ;;  %v818_v59 = vpop.f32.mrb[67].mxu0 }
 0x1cc   : > { %971 = vst [vmem:[%s1619_s15 + $0x8] sm:$0xff] %v817_v58 }
 0x1cd   : > { %v821_v60 = vpop.f32.mrb[68].mxu0 }
 0x1ce   : > { %v822_v61 = vadd.f32 %v1612_v55, %v821_v60  ;;  %v823_v62 = vpop.f32.mrb[69].mxu0 }
 0x1d0   : > { %972 = vst [vmem:[%s1619_s15 + $0x10] sm:$0xff] %v822_v61 }
 0x1d1   : > { %v826_v63 = vpop.f32.mrb[70].mxu0 }
 0x1d2   : > { %v827_v0 = vadd.f32 %v1612_v55, %v826_v63  ;;  %v828_v1 = vpop.f32.mrb[71].mxu0 }
 0x1d4   : > { %973 = vst [vmem:[%s1619_s15 + $0x18] sm:$0xff] %v827_v0 }
 0x1d5   : > { %v831_v2 = vpop.f32.mrb[72].mxu0 }
 0x1d6   : > { %v832_v3 = vadd.f32 %v1612_v55, %v831_v2  ;;  %v833_v4 = vpop.f32.mrb[73].mxu0 }
 0x1d8   : > { %974 = vst [vmem:[%s1619_s15 + $0x20] sm:$0xff] %v832_v3 }
 0x1d9   : > { %v836_v5 = vpop.f32.mrb[74].mxu0 }
 0x1da   : > { %v837_v6 = vadd.f32 %v1612_v55, %v836_v5  ;;  %v838_v8 = vpop.f32.mrb[75].mxu0 }
 0x1dc   : > { %975 = vst [vmem:[%s1619_s15 + $0x28] sm:$0xff] %v837_v6 }
 0x1dd   : > { %v841_v9 = vpop.f32.mrb[0].mxu1 }
 0x1de   : > { %v842_v10 = vadd.f32 %v1612_v55, %v841_v9  ;;  %v843_v11 = vpop.f32.mrb[1].mxu1 }
 0x1e0   : > { %976 = vst [vmem:[%s1619_s15 + $0x30] sm:$0xff] %v842_v10 }
 0x1e1   : > { %v846_v12 = vpop.f32.mrb[2].mxu1 }
 0x1e2   : > { %v847_v13 = vadd.f32 %v1612_v55, %v846_v12  ;;  %v848_v14 = vpop.f32.mrb[3].mxu1 }
 0x1e4   : > { %977 = vst [vmem:[%s1619_s15 + $0x38] sm:$0xff] %v847_v13 }
 0x1e5   : > { %v851_v15 = vpop.f32.mrb[4].mxu1 }
 0x1e6   : > { %v852_v16 = vadd.f32 %v1612_v55, %v851_v15  ;;  %v853_v17 = vpop.f32.mrb[5].mxu1 }
 0x1e8   : > { %978 = vst [vmem:[%s1619_s15 + $0x40] sm:$0xff] %v852_v16 }
 0x1e9   : > { %v856_v18 = vpop.f32.mrb[6].mxu1 }
 0x1ea   : > { %v857_v19 = vadd.f32 %v1612_v55, %v856_v18  ;;  %v858_v20 = vpop.f32.mrb[7].mxu1 }
 0x1ec   : > { %979 = vst [vmem:[%s1619_s15 + $0x48] sm:$0xff] %v857_v19 }
 0x1ed   : > { %v861_v21 = vpop.f32.mrb[8].mxu1 }
 0x1ee   : > { %v862_v22 = vadd.f32 %v1612_v55, %v861_v21  ;;  %v863_v23 = vpop.f32.mrb[9].mxu1 }
 0x1f0   : > { %980 = vst [vmem:[%s1619_s15 + $0x50] sm:$0xff] %v862_v22 }
 0x1f1   : > { %v866_v24 = vpop.f32.mrb[10].mxu1 }
 0x1f2   : > { %v867_v25 = vadd.f32 %v1612_v55, %v866_v24  ;;  %v868_v27 = vpop.f32.mrb[11].mxu1 }
 0x1f4   : > { %981 = vst [vmem:[%s1619_s15 + $0x58] sm:$0xff] %v867_v25 }
 0x1f5   : > { %v871_v28 = vpop.f32.mrb[12].mxu1 }
 0x1f6   : > { %v872_v29 = vadd.f32 %v1612_v55, %v871_v28  ;;  %v873_v30 = vpop.f32.mrb[13].mxu1 }
 0x1f8   : > { %982 = vst [vmem:[%s1619_s15 + $0x60] sm:$0xff] %v872_v29 }
 0x1f9   : > { %v876_v31 = vpop.f32.mrb[14].mxu1 }
 0x1fa   : > { %v877_v32 = vadd.f32 %v1612_v55, %v876_v31  ;;  %v878_v33 = vpop.f32.mrb[15].mxu1 }
 0x1fc   : > { %983 = vst [vmem:[%s1619_s15 + $0x68] sm:$0xff] %v877_v32 }
 0x1fd   : > { %v881_v34 = vpop.f32.mrb[16].mxu1 }
 0x1fe   : > { %v882_v35 = vadd.f32 %v1612_v55, %v881_v34  ;;  %v883_v36 = vpop.f32.mrb[17].mxu1 }
 0x200   : > { %984 = vst [vmem:[%s1619_s15 + $0x70] sm:$0xff] %v882_v35 }
 0x201   : > { %v886_v26 = vpop.f32.mrb[18].mxu1 }
 0x202   : > { %v887_v37 = vadd.f32 %v1612_v55, %v886_v26  ;;  %v888_v38 = vpop.f32.mrb[19].mxu1 }
 0x204   : > { %985 = vst [vmem:[%s1619_s15 + $0x78] sm:$0xff] %v887_v37 }
 0x205   : > { %v891_v39 = vpop.f32.mrb[20].mxu1 }
 0x206   : > { %v892_v40 = vadd.f32 %v1612_v55, %v891_v39  ;;  %v893_v41 = vpop.f32.mrb[21].mxu1 }
 0x208   : > { %986 = vst [vmem:[%s1619_s15 + $0x80] sm:$0xff] %v892_v40 }
 0x209   : > { %v896_v42 = vpop.f32.mrb[22].mxu1 }
 0x20a   : > { %v897_v43 = vadd.f32 %v1612_v55, %v896_v42  ;;  %v898_v44 = vpop.f32.mrb[23].mxu1 }
 0x20c   : > { %987 = vst [vmem:[%s1619_s15 + $0x88] sm:$0xff] %v897_v43 }
 0x20d   : > { %v901_v45 = vpop.f32.mrb[24].mxu1 }
 0x20e   : > { %v902_v46 = vadd.f32 %v1612_v55, %v901_v45  ;;  %v903_v47 = vpop.f32.mrb[25].mxu1 }
 0x210   : > { %988 = vst [vmem:[%s1619_s15 + $0x90] sm:$0xff] %v902_v46 }
 0x211   : > { %v906_v50 = vpop.f32.mrb[26].mxu1 }
 0x212   : > { %v907_v51 = vadd.f32 %v1612_v55, %v906_v50  ;;  %v908_v52 = vpop.f32.mrb[27].mxu1 }
 0x214   : > { %989 = vst [vmem:[%s1619_s15 + $0x98] sm:$0xff] %v907_v51 }
 0x215   : > { %v911_v7 = vpop.f32.mrb[28].mxu1 }
 0x216   : > { %v912_v53 = vadd.f32 %v1612_v55, %v911_v7  ;;  %v913_v54 = vpop.f32.mrb[29].mxu1 }
 0x218   : > { %990 = vst [vmem:[%s1619_s15 + $0xa0] sm:$0xff] %v912_v53 }
 0x219   : > { %v916_v48 = vpop.f32.mrb[30].mxu1 }
 0x21a   : > { %v917_v49 = vadd.f32 %v1612_v55, %v916_v48  ;;  %v918_v56 = vpop.f32.mrb[31].mxu1 }
 0x21c   : > { %991 = vst [vmem:[%s1619_s15 + $0xa8] sm:$0xff] %v917_v49 }
 0x21d   : > { %v921_v57 = vpop.f32.mrb[32].mxu1 }
 0x21e   : > { %v922_v58 = vadd.f32 %v1612_v55, %v921_v57  ;;  %v923_v59 = vpop.f32.mrb[33].mxu1 }
 0x220   : > { %992 = vst [vmem:[%s1619_s15 + $0xb0] sm:$0xff] %v922_v58 }
 0x221   : > { %v926_v60 = vpop.f32.mrb[34].mxu1 }
 0x222   : > { %v927_v61 = vadd.f32 %v1612_v55, %v926_v60  ;;  %v928_v62 = vpop.f32.mrb[35].mxu1 }
 0x224   : > { %993 = vst [vmem:[%s1619_s15 + $0xb8] sm:$0xff] %v927_v61 }
 0x225   : > { %v931_v63 = vpop.f32.mrb[36].mxu1 }
 0x226   : > { %v932_v0 = vadd.f32 %v1612_v55, %v931_v63  ;;  %v933_v1 = vpop.f32.mrb[37].mxu1 }
 0x228   : > { %994 = vst [vmem:[%s1619_s15 + $0xc0] sm:$0xff] %v932_v0 }
 0x229   : > { %v936_v2 = vpop.f32.mrb[38].mxu1 }
 0x22a   : > { %v937_v3 = vadd.f32 %v1612_v55, %v936_v2  ;;  %v938_v4 = vpop.f32.mrb[39].mxu1 }
 0x22c   : > { %995 = vst [vmem:[%s1619_s15 + $0xc8] sm:$0xff] %v937_v3 }
 0x22d   : > { %v941_v5 = vpop.f32.mrb[40].mxu1 }
 0x22e   : > { %v942_v6 = vadd.f32 %v1612_v55, %v941_v5  ;;  %v943_v8 = vpop.f32.mrb[41].mxu1 }
 0x230   : > { %996 = vst [vmem:[%s1619_s15 + $0xd0] sm:$0xff] %v942_v6 }
 0x231   : > { %v946_v9 = vpop.f32.mrb[42].mxu1 }
 0x232   : > { %v947_v10 = vadd.f32 %v1612_v55, %v946_v9  ;;  %v948_v11 = vpop.f32.mrb[43].mxu1 }
 0x234   : > { %997 = vst [vmem:[%s1619_s15 + $0xd8] sm:$0xff] %v947_v10 }
 0x235   : > { %v951_v12 = vpop.f32.mrb[44].mxu1 }
 0x236   : > { %v952_v13 = vadd.f32 %v1612_v55, %v951_v12  ;;  %v953_v14 = vpop.f32.mrb[45].mxu1 }
 0x238   : > { %998 = vst [vmem:[%s1619_s15 + $0xe0] sm:$0xff] %v952_v13 }
 0x239   : > { %v956_v15 = vpop.f32.mrb[46].mxu1 }
 0x23a   : > { %v957_v16 = vadd.f32 %v1612_v55, %v956_v15  ;;  %v958_v17 = vpop.f32.mrb[47].mxu1 }
 0x23c   : > { %999 = vst [vmem:[%s1619_s15 + $0xe8] sm:$0xff] %v957_v16 }
 0x23d   : > { %v961_v18 = vpop.f32.mrb[48].mxu1 }
 0x23e   : > { %v962_v19 = vadd.f32 %v1612_v55, %v961_v18  ;;  %v963_v20 = vpop.f32.mrb[49].mxu1 }
 0x240   : > { %1000 = vst [vmem:[%s1619_s15 + $0xf0] sm:$0xff] %v962_v19 }
 0x241   : > { %v966_v21 = vpop.f32.mrb[50].mxu1 }
 0x242   : > { %v967_v22 = vadd.f32 %v1612_v55, %v966_v21  ;;  %v968_v23 = vpop.f32.mrb[51].mxu1 }
 0x244   : > { %1001 = vst [vmem:[%s1619_s15 + $0xf8] sm:$0xff] %v967_v22 }
 0x245 PF: > { %s15_s18 = sadd.s32 1, %s1214_s18  }
 0x246   : > { %p12_p4 = scmp.ge.s32.totalorder %s15_s18, 4  }
 0x248   :  { %14 = sbr.rel (!%p12_p4) target bundleno = 1 (0x1), region = 70 }

</bundles_post_ra>
